<compile_context>
chip_gen: v6e
topology: v6e:2x2x1
jax: 0.10.0
libtpu: 0.0.40
codegen_flags: <defaults>
</compile_context>

<pallas_src>
import functools

import numpy as np
import jax
import jax.numpy as jnp
from jax import lax
from jax.experimental import pallas as pl
from jax.experimental.pallas import tpu as pltpu

bn_eps = 2e-05
group_base = 8

COMPUTE_DTYPE = jnp.bfloat16   # MXU-native operand dtype; accumulation is f32
MAX_BATCH_TILE = 1024          # rows per grid step (amortizes ~0.35us/step)
MIN_BATCH_TILE = 16            # sublane-aligned tile granularity (bf16 input)


def _round_up(x, m):
    return (x + m - 1) // m * m


def _cdiv(a, b):
    return -(-a // b)


# ----------------------------- Pallas kernels -------------------------------

def _head(y, wc_ref, bc_ref, a2_ref, wfc_ref, b3_ref, o_ref):
    # fused: [conv1(7x7 grouped)+bn1+conv2(1x1)+bn2] as one dense matmul,
    # PReLU, then [fc + bn1d] as one matmul.  All lane dims padded to 128.
    z = jnp.dot(y.astype(wc_ref.dtype), wc_ref[...],
                preferred_element_type=jnp.float32)
    z = z + bc_ref[...]
    z = jnp.where(z >= 0.0, z, a2_ref[...] * z)
    out = jnp.dot(z.astype(wfc_ref.dtype), wfc_ref[...],
                  preferred_element_type=jnp.float32)
    o_ref[...] = out + b3_ref[...]


def fused_kernel_stage1(x_ref, w0_ref, b0_ref, a0_ref,
                        wc_ref, bc_ref, a2_ref, wfc_ref, b3_ref, o_ref):
    # stage 1: conv0(1x1)+bn0 folded into kron(W0*s0, I_49), then PReLU.
    # Input and output of this matmul are channel-major / pixel-minor, so the
    # raw NCHW flatten is consumed directly (no wrapper transpose).
    y = jnp.dot(x_ref[...], w0_ref[...], preferred_element_type=jnp.float32)
    y = y + b0_ref[...]
    y = jnp.where(y >= 0.0, y, a0_ref[...] * y)
    _head(y, wc_ref, bc_ref, a2_ref, wfc_ref, b3_ref, o_ref)


def fused_kernel_nostage1(x_ref, wc_ref, bc_ref, a2_ref, wfc_ref, b3_ref, o_ref):
    # module skips conv0/bn0/PReLU when input_channels == last_channels
    _head(x_ref[...], wc_ref, bc_ref, a2_ref, wfc_ref, b3_ref, o_ref)


# ------------------------- weight folding (load time) -----------------------

def _bn_fold(gamma, beta, mean, var, eps=bn_eps):
    gamma, beta, mean, var = (np.asarray(t, np.float32)
                              for t in (gamma, beta, mean, var))
    scale = gamma / np.sqrt(var + eps)
    return scale, beta - mean * scale


def prepare_params(p, compute_dtype=COMPUTE_DTYPE):
    """One-time weight prep (hoisted out of the per-call path, vectorized).

    All folded matmul weights are laid out so the kernel consumes the raw
    NCHW flatten of the input, i.e. feature index = channel*49 + pixel
    (channel-major / pixel-minor).  Both the stage-1 and no-stage-1 paths use
    the SAME `wc`, so the two branches cannot silently diverge.
    """
    w0 = np.asarray(p["w0"], np.float32)               # (C, Cin, 1, 1)
    w1 = np.asarray(p["w1"], np.float32)               # (C, C/groups, 7, 7)
    w2 = np.asarray(p["w2"], np.float32)[:, :, 0, 0]   # (C/2, C)
    wfc = np.asarray(p["wfc"], np.float32)             # (emb, C/2)

    C, ipg, kh, kw = w1.shape
    P = kh * kw                                        # 49 pixel positions
    Cin = w0.shape[1]
    groups = C // group_base
    opg = C // groups
    assert ipg == C // groups
    chalf, emb = w2.shape[0], wfc.shape[0]

    s1, b1 = _bn_fold(p["bn1_g"], p["bn1_b"], p["bn1_m"], p["bn1_v"])
    s2, b2 = _bn_fold(p["bn2_g"], p["bn2_b"], p["bn2_m"], p["bn2_v"])
    s3, b3 = _bn_fold(p["bn_g"], p["bn_b"], p["bn_m"], p["bn_v"])

    # grouped 7x7 conv (VALID on 7x7 -> spatial collapses) as a (C*P, C)
    # matmul with rows ordered channel-major / pixel-minor (c_in*P + p).
    w1g = w1.reshape(groups, opg, ipg, P)              # [g, o_l, c_l, p]
    w1full = np.zeros((C, P, C), np.float32)           # [c_in, p, o]
    for g in range(groups):
        w1full[g * ipg:(g + 1) * ipg, :, g * opg:(g + 1) * opg] = \
            np.transpose(w1g[g], (1, 2, 0))            # [c_l, p, o_l]
    w1full = w1full.reshape(C * P, C)

    c_pad = _round_up(chalf, 128)                      # lane-dense C/2 dim
    e_pad = _round_up(emb, 128)                        # lane-dense output

    # fold bn1 + conv2(1x1) + bn2 into ONE dense (C*P, c_pad) weight + bias.
    wc = (w1full * s1[None, :]) @ (w2.T * s2[None, :])         # (C*P, chalf)
    bc = (b1 @ w2.T) * s2 + b2

    wc_pad = np.zeros((C * P, c_pad), np.float32)
    wc_pad[:, :chalf] = wc
    bc_pad = np.zeros((c_pad,), np.float32)
    bc_pad[:chalf] = bc
    a2_pad = np.zeros((c_pad,), np.float32)
    a2_pad[:chalf] = np.asarray(p["alpha2"], np.float32)

    # fold bn1d into the fc weight; pad contraction rows to c_pad and
    # out-features to a lane-dense multiple of 128.
    wfc_s = wfc.T * s3[None, :]                        # (chalf, emb)
    wfc_pad = np.zeros((c_pad, e_pad), np.float32)
    wfc_pad[:chalf, :emb] = wfc_s
    b3_pad = np.zeros((e_pad,), np.float32)
    b3_pad[:emb] = b3

    prep = {
        "wc": jnp.asarray(wc_pad, compute_dtype),
        "bc": jnp.asarray(bc_pad[None, :], jnp.float32),
        "a2": jnp.asarray(a2_pad[None, :], jnp.float32),
        "wfc": jnp.asarray(wfc_pad, compute_dtype),
        "b3": jnp.asarray(b3_pad[None, :], jnp.float32),
    }
    has_stage1 = (Cin != C)
    if has_stage1:
        s0, b0 = _bn_fold(p["bn0_g"], p["bn0_b"], p["bn0_m"], p["bn0_v"])
        w0s = w0[:, :, 0, 0].T * s0[None, :]           # (Cin, C)
        # per-pixel 1x1 conv, channel-major layout on both sides:
        # W[c*P+p, o*P+p'] = w0s[c, o] * delta(p, p')  ==  kron(w0s, I_P)
        prep["w0k"] = jnp.asarray(np.kron(w0s, np.eye(P, dtype=np.float32)),
                                  compute_dtype)
        prep["b0"] = jnp.asarray(np.repeat(b0, P)[None, :], jnp.float32)
        prep["a0"] = jnp.asarray(
            np.repeat(np.asarray(p["alpha0"], np.float32), P)[None, :],
            jnp.float32)
    return prep, has_stage1, emb


# ------------------------------- forward ------------------------------------

def _full_spec(a):
    return pl.BlockSpec(a.shape, lambda i: (0,) * a.ndim)


def embedding_block_forward(x_nchw, prep, *, has_stage1, emb):
    N, Cin, H, W = x_nchw.shape
    if (H, W) != (7, 7):
        raise ValueError("Embedding_Block requires 7x7 spatial input so the "
                         "7x7 VALID grouped conv collapses space to 1x1.")
    # Free view: NCHW flatten -> (N, Cin*49), channel-major / pixel-minor.
    # Weights were prepared for this ordering, so no XLA relayout is emitted.
    x_flat = x_nchw.reshape(N, Cin * H * W).astype(COMPUTE_DTYPE)

    # Batch tiling: large tiles to amortize per-grid-step overhead, minimal
    # padding waste, and >=2 parallel grid steps (when the batch allows) so
    # v7x's two TensorCores both get work.
    n_tiles = max(1, _cdiv(N, MAX_BATCH_TILE))
    if n_tiles == 1 and N >= 2 * MIN_BATCH_TILE:
        n_tiles = 2
    tn = _round_up(_cdiv(N, n_tiles), MIN_BATCH_TILE)
    n_pad = tn * n_tiles
    if n_pad != N:
        x_flat = jnp.pad(x_flat, ((0, n_pad - N), (0, 0)))
    e_pad = prep["wfc"].shape[1]

    if has_stage1:
        kernel = fused_kernel_stage1
        consts = (prep["w0k"], prep["b0"], prep["a0"],
                  prep["wc"], prep["bc"], prep["a2"], prep["wfc"], prep["b3"])
    else:
        kernel = fused_kernel_nostage1
        consts = (prep["wc"], prep["bc"], prep["a2"], prep["wfc"], prep["b3"])

    out = pl.pallas_call(
        kernel,
        out_shape=jax.ShapeDtypeStruct((n_pad, e_pad), jnp.float32),
        grid=(n_tiles,),
        in_specs=[pl.BlockSpec((tn, x_flat.shape[1]), lambda i: (i, 0))]
                 + [_full_spec(c) for c in consts],
        out_specs=pl.BlockSpec((tn, e_pad), lambda i: (i, 0)),
        compiler_params=pltpu.CompilerParams(
            dimension_semantics=("parallel",)),
    )(x_flat, *consts)
    return out[:N, :emb]


def make_forward(params):
    prep, has_stage1, emb = prepare_params(params)
    return jax.jit(functools.partial(embedding_block_forward, prep=prep,
                                     has_stage1=has_stage1, emb=emb))


# --------------------------- pure-JAX reference ------------------------------

def embedding_block_reference(x, p):
    last_channels = p["w1"].shape[0]
    groups = last_channels // group_base

    def bn2d(y, g, b, m, v):
        inv = 1.0 / jnp.sqrt(v + bn_eps)
        return ((y - m[None, :, None, None]) * (g * inv)[None, :, None, None]
                + b[None, :, None, None])

    def prelu(y, a):
        return jnp.where(y >= 0, y, a[None, :, None, None] * y)

    dn = ("NCHW", "OIHW", "NCHW")
    y = x
    if x.shape[1] != last_channels:      # same conditional as the module
        y = lax.conv_general_dilated(y, p["w0"], (1, 1), "VALID",
                                     dimension_numbers=dn)
        y = prelu(bn2d(y, p["bn0_g"], p["bn0_b"], p["bn0_m"], p["bn0_v"]),
                  p["alpha0"])
    y = lax.conv_general_dilated(y, p["w1"], (1, 1), "VALID",
                                 feature_group_count=groups,
                                 dimension_numbers=dn)
    y = bn2d(y, p["bn1_g"], p["bn1_b"], p["bn1_m"], p["bn1_v"])
    y = lax.conv_general_dilated(y, p["w2"], (1, 1), "VALID",
                                 dimension_numbers=dn)
    y = bn2d(y, p["bn2_g"], p["bn2_b"], p["bn2_m"], p["bn2_v"])
    y = prelu(y, p["alpha2"])
    y = y.reshape(y.shape[0], -1)
    y = y @ p["wfc"].T
    return (y - p["bn_m"]) / jnp.sqrt(p["bn_v"] + bn_eps) * p["bn_g"] + p["bn_b"]


# ---------------------------------- main -------------------------------------

if __name__ == "__main__":
    C_last, emb_size = 16, 32
    C_half = C_last // 2
    in_per_g = group_base

    key = jax.random.PRNGKey(0)
    ks = jax.random.split(key, 16)

    def bn_params(k, c):
        k1, k2, k3, k4 = jax.random.split(k, 4)
        return dict(
            g=jax.random.uniform(k1, (c,), minval=0.5, maxval=1.5),
            b=0.1 * jax.random.normal(k2, (c,)),
            m=0.1 * jax.random.normal(k3, (c,)),
            v=jax.random.uniform(k4, (c,), minval=0.5, maxval=1.5),
        )

    bn0 = bn_params(ks[4], C_last)
    bn1 = bn_params(ks[5], C_last)
    bn2 = bn_params(ks[6], C_half)
    bnf = bn_params(ks[7], emb_size)

    def make_params(c_in):
        p = {
            "w0": 0.2 * jax.random.normal(ks[0], (C_last, c_in, 1, 1)),
            "w1": 0.1 * jax.random.normal(ks[1], (C_last, in_per_g, 7, 7)),
            "w2": 0.2 * jax.random.normal(ks[2], (C_half, C_last, 1, 1)),
            "wfc": 0.2 * jax.random.normal(ks[3], (emb_size, C_half)),
            "alpha0": jnp.full((C_last,), 0.25, jnp.float32),
            "alpha2": jnp.full((C_half,), 0.25, jnp.float32),
            "bn0_g": bn0["g"], "bn0_b": bn0["b"], "bn0_m": bn0["m"], "bn0_v": bn0["v"],
            "bn1_g": bn1["g"], "bn1_b": bn1["b"], "bn1_m": bn1["m"], "bn1_v": bn1["v"],
            "bn2_g": bn2["g"], "bn2_b": bn2["b"], "bn2_m": bn2["m"], "bn2_v": bn2["v"],
            "bn_g": bnf["g"], "bn_b": bnf["b"], "bn_m": bnf["m"], "bn_v": bnf["v"],
        }
        return {k: v.astype(jnp.float32) for k, v in p.items()}

    # tolerance: matmul operands are bf16 (f32 accumulation)
    tol = dict(rtol=2e-2, atol=2e-2)

    # Case A: input_channels != last_channels -> conv0+bn0+PReLU path active.
    p_a = make_params(8)
    x_a = jax.random.normal(ks[10], (2, 8, 7, 7), jnp.float32)
    fwd_a = make_forward(p_a)
    out_a = jax.block_until_ready(fwd_a(x_a))
    ref_a = jax.block_until_ready(embedding_block_reference(x_a, p_a))
    assert out_a.shape == (2, emb_size)
    np.testing.assert_allclose(np.asarray(out_a), np.asarray(ref_a), **tol)

    # Case B: input_channels == last_channels -> module skips conv0/bn0/PReLU.
    p_b = make_params(C_last)
    x_b = jax.random.normal(ks[11], (3, C_last, 7, 7), jnp.float32)
    fwd_b = make_forward(p_b)
    out_b = jax.block_until_ready(fwd_b(x_b))
    ref_b = jax.block_until_ready(embedding_block_reference(x_b, p_b))
    assert out_b.shape == (3, emb_size)
    np.testing.assert_allclose(np.asarray(out_b), np.asarray(ref_b), **tol)

    # Case C: larger batch -> exercises the multi-tile (>=2 parallel grid
    # steps) path with row padding (40 -> 2 tiles of 32).
    x_c = jax.random.normal(ks[12], (40, 8, 7, 7), jnp.float32)
    out_c = jax.block_until_ready(fwd_a(x_c))
    ref_c = jax.block_until_ready(embedding_block_reference(x_c, p_a))
    assert out_c.shape == (40, emb_size)
    np.testing.assert_allclose(np.asarray(out_c), np.asarray(ref_c), **tol)

    print("KERNEL_OK")
</pallas_src>

<mosaic_0001>
module attributes {stable_mosaic.version = 11 : i64} {
  func.func @fused_kernel_stage1(%arg0: i32, %arg1: memref<16x392xbf16, #tpu.memory_space<vmem>>, %arg2: memref<392x784xbf16, #tpu.memory_space<vmem>>, %arg3: memref<1x784xf32, #tpu.memory_space<vmem>>, %arg4: memref<1x784xf32, #tpu.memory_space<vmem>>, %arg5: memref<784x128xbf16, #tpu.memory_space<vmem>>, %arg6: memref<1x128xf32, #tpu.memory_space<vmem>>, %arg7: memref<1x128xf32, #tpu.memory_space<vmem>>, %arg8: memref<128x128xbf16, #tpu.memory_space<vmem>>, %arg9: memref<1x128xf32, #tpu.memory_space<vmem>>, %arg10: memref<16x128xf32, #tpu.memory_space<vmem>>) attributes {dimension_semantics = [#tpu.dimension_semantics<parallel>], iteration_bounds = array<i64: 1>, scalar_prefetch = 0 : i64, scratch_operands = 0 : i64, tpu.core_type = #tpu.core_type<tc>, window_params = [{transform_indices = @transform_0, window_bounds = array<i64: 16, 392>}, {pipeline_mode = #tpu.pipeline_mode<synchronous>, transform_indices = @transform_1, window_bounds = array<i64: 392, 784>}, {pipeline_mode = #tpu.pipeline_mode<synchronous>, transform_indices = @transform_2, window_bounds = array<i64: 1, 784>}, {pipeline_mode = #tpu.pipeline_mode<synchronous>, transform_indices = @transform_3, window_bounds = array<i64: 1, 784>}, {pipeline_mode = #tpu.pipeline_mode<synchronous>, transform_indices = @transform_4, window_bounds = array<i64: 784, 128>}, {pipeline_mode = #tpu.pipeline_mode<synchronous>, transform_indices = @transform_5, window_bounds = array<i64: 1, 128>}, {pipeline_mode = #tpu.pipeline_mode<synchronous>, transform_indices = @transform_6, window_bounds = array<i64: 1, 128>}, {pipeline_mode = #tpu.pipeline_mode<synchronous>, transform_indices = @transform_7, window_bounds = array<i64: 128, 128>}, {pipeline_mode = #tpu.pipeline_mode<synchronous>, transform_indices = @transform_8, window_bounds = array<i64: 1, 128>}, {transform_indices = @transform_9, window_bounds = array<i64: 16, 128>}]} {
    %c0 = arith.constant 0 : index
    %c0_0 = arith.constant 0 : index
    %0 = vector.load %arg1[%c0, %c0_0] : memref<16x392xbf16, #tpu.memory_space<vmem>>, vector<16x392xbf16>
    %c0_1 = arith.constant 0 : index
    %c0_2 = arith.constant 0 : index
    %1 = vector.load %arg2[%c0_1, %c0_2] : memref<392x784xbf16, #tpu.memory_space<vmem>>, vector<392x784xbf16>
    %cst = arith.constant dense<0.000000e+00> : vector<16x784xf32>
    %2 = tpu.matmul %0, %1, %cst {dimension_numbers = #tpu.dot_dimension_numbers<[1], [0], [0], [1], [0, 0, 1, 1], [], []>} : vector<16x392xbf16>, vector<392x784xbf16>, vector<16x784xf32> -> vector<16x784xf32>
    %c0_3 = arith.constant 0 : index
    %c0_4 = arith.constant 0 : index
    %3 = vector.load %arg3[%c0_3, %c0_4] : memref<1x784xf32, #tpu.memory_space<vmem>>, vector<1x784xf32>
    %4 = vector.broadcast %3 : vector<1x784xf32> to vector<16x784xf32>
    %5 = arith.addf %2, %4 : vector<16x784xf32>
    %cst_5 = arith.constant 0.000000e+00 : f32
    %6 = vector.broadcast %cst_5 : f32 to vector<16x784xf32>
    %7 = arith.cmpf oge, %5, %6 : vector<16x784xf32>
    %c0_6 = arith.constant 0 : index
    %c0_7 = arith.constant 0 : index
    %8 = vector.load %arg4[%c0_6, %c0_7] : memref<1x784xf32, #tpu.memory_space<vmem>>, vector<1x784xf32>
    %9 = vector.broadcast %8 : vector<1x784xf32> to vector<16x784xf32>
    %10 = arith.mulf %9, %5 : vector<16x784xf32>
    %11 = arith.select %7, %5, %10 : vector<16x784xi1>, vector<16x784xf32>
    %12 = arith.truncf %11 : vector<16x784xf32> to vector<16x784xbf16>
    %c0_8 = arith.constant 0 : index
    %c0_9 = arith.constant 0 : index
    %13 = vector.load %arg5[%c0_8, %c0_9] : memref<784x128xbf16, #tpu.memory_space<vmem>>, vector<784x128xbf16>
    %cst_10 = arith.constant dense<0.000000e+00> : vector<16x128xf32>
    %14 = tpu.matmul %12, %13, %cst_10 {dimension_numbers = #tpu.dot_dimension_numbers<[1], [0], [0], [1], [0, 0, 1, 1], [], []>} : vector<16x784xbf16>, vector<784x128xbf16>, vector<16x128xf32> -> vector<16x128xf32>
    %c0_11 = arith.constant 0 : index
    %c0_12 = arith.constant 0 : index
    %15 = vector.load %arg6[%c0_11, %c0_12] : memref<1x128xf32, #tpu.memory_space<vmem>>, vector<1x128xf32>
    %16 = vector.broadcast %15 : vector<1x128xf32> to vector<16x128xf32>
    %17 = arith.addf %14, %16 : vector<16x128xf32>
    %cst_13 = arith.constant 0.000000e+00 : f32
    %18 = vector.broadcast %cst_13 : f32 to vector<16x128xf32>
    %19 = arith.cmpf oge, %17, %18 : vector<16x128xf32>
    %c0_14 = arith.constant 0 : index
    %c0_15 = arith.constant 0 : index
    %20 = vector.load %arg7[%c0_14, %c0_15] : memref<1x128xf32, #tpu.memory_space<vmem>>, vector<1x128xf32>
    %21 = vector.broadcast %20 : vector<1x128xf32> to vector<16x128xf32>
    %22 = arith.mulf %21, %17 : vector<16x128xf32>
    %23 = arith.select %19, %17, %22 : vector<16x128xi1>, vector<16x128xf32>
    %24 = arith.truncf %23 : vector<16x128xf32> to vector<16x128xbf16>
    %c0_16 = arith.constant 0 : index
    %c0_17 = arith.constant 0 : index
    %25 = vector.load %arg8[%c0_16, %c0_17] : memref<128x128xbf16, #tpu.memory_space<vmem>>, vector<128x128xbf16>
    %cst_18 = arith.constant dense<0.000000e+00> : vector<16x128xf32>
    %26 = tpu.matmul %24, %25, %cst_18 {dimension_numbers = #tpu.dot_dimension_numbers<[1], [0], [0], [1], [0, 0, 1, 1], [], []>} : vector<16x128xbf16>, vector<128x128xbf16>, vector<16x128xf32> -> vector<16x128xf32>
    %c0_19 = arith.constant 0 : index
    %c0_20 = arith.constant 0 : index
    %27 = vector.load %arg9[%c0_19, %c0_20] : memref<1x128xf32, #tpu.memory_space<vmem>>, vector<1x128xf32>
    %28 = vector.broadcast %27 : vector<1x128xf32> to vector<16x128xf32>
    %29 = arith.addf %26, %28 : vector<16x128xf32>
    %c0_21 = arith.constant 0 : index
    %c0_22 = arith.constant 0 : index
    %30 = vector.load %arg10[%c0_21, %c0_22] : memref<16x128xf32, #tpu.memory_space<vmem>>, vector<16x128xf32>
    tpu.vector_store %arg10[%c0_21, %c0_22], %29 {strides = array<i32>} : memref<16x128xf32, #tpu.memory_space<vmem>>, vector<16x128xf32>,
    return
  }
  func.func @transform_0(%arg0: i32) -> (i32, i32) {
    %c0_i32 = arith.constant 0 : i32
    %c0_i32_0 = arith.constant 0 : i32
    return %arg0, %c0_i32 : i32, i32
  }
  func.func @transform_1(%arg0: i32) -> (i32, i32) {
    %c0_i32 = arith.constant 0 : i32
    %c0_i32_0 = arith.constant 0 : i32
    %c0_i32_1 = arith.constant 0 : i32
    return %c0_i32, %c0_i32_0 : i32, i32
  }
  func.func @transform_2(%arg0: i32) -> (i32, i32) {
    %c0_i32 = arith.constant 0 : i32
    %c0_i32_0 = arith.constant 0 : i32
    %c0_i32_1 = arith.constant 0 : i32
    return %c0_i32, %c0_i32_0 : i32, i32
  }
  func.func @transform_3(%arg0: i32) -> (i32, i32) {
    %c0_i32 = arith.constant 0 : i32
    %c0_i32_0 = arith.constant 0 : i32
    %c0_i32_1 = arith.constant 0 : i32
    return %c0_i32, %c0_i32_0 : i32, i32
  }
  func.func @transform_4(%arg0: i32) -> (i32, i32) {
    %c0_i32 = arith.constant 0 : i32
    %c0_i32_0 = arith.constant 0 : i32
    %c0_i32_1 = arith.constant 0 : i32
    return %c0_i32, %c0_i32_0 : i32, i32
  }
  func.func @transform_5(%arg0: i32) -> (i32, i32) {
    %c0_i32 = arith.constant 0 : i32
    %c0_i32_0 = arith.constant 0 : i32
    %c0_i32_1 = arith.constant 0 : i32
    return %c0_i32, %c0_i32_0 : i32, i32
  }
  func.func @transform_6(%arg0: i32) -> (i32, i32) {
    %c0_i32 = arith.constant 0 : i32
    %c0_i32_0 = arith.constant 0 : i32
    %c0_i32_1 = arith.constant 0 : i32
    return %c0_i32, %c0_i32_0 : i32, i32
  }
  func.func @transform_7(%arg0: i32) -> (i32, i32) {
    %c0_i32 = arith.constant 0 : i32
    %c0_i32_0 = arith.constant 0 : i32
    %c0_i32_1 = arith.constant 0 : i32
    return %c0_i32, %c0_i32_0 : i32, i32
  }
  func.func @transform_8(%arg0: i32) -> (i32, i32) {
    %c0_i32 = arith.constant 0 : i32
    %c0_i32_0 = arith.constant 0 : i32
    %c0_i32_1 = arith.constant 0 : i32
    return %c0_i32, %c0_i32_0 : i32, i32
  }
  func.func @transform_9(%arg0: i32) -> (i32, i32) {
    %c0_i32 = arith.constant 0 : i32
    %c0_i32_0 = arith.constant 0 : i32
    return %arg0, %c0_i32 : i32, i32
  }
}

</mosaic_0001>

<bundles_post_ra>
// kernel: embedding_block_forward.1
= control target key start
LH: loop header
LB: loop body
LE: loop exit
PB: predicated region body
PF: predicated region fallthrough
CT: control target
= control target key end

     0   :  { %14 = vsyncpa [#allocation3], 0  ;;  %s3290_s0 = inlined_call_operand.vmem [shape: bf16[16,392], index: 0, kind: input, shape index: {}]   ;;  %s3291_s1 = inlined_call_operand.hbm [shape: bf16[392,784], index: 1, kind: input, shape index: {}]   ;;  %s3292_s2 = inlined_call_operand.vmem [shape: f32[1,784], index: 2, kind: input, shape index: {}]   ;;  %s3293_s3 = inlined_call_operand.vmem [shape: f32[1,784], index: 3, kind: input, shape index: {}]   ;;  %s3294_s4 = inlined_call_operand.hbm [shape: bf16[784,128], index: 4, kind: input, shape index: {}]   ;;  %s3295_s5 = inlined_call_operand.vmem [shape: f32[1,128], index: 5, kind: input, shape index: {}]   ;;  %s3296_s6 = inlined_call_operand.vmem [shape: f32[1,128], index: 6, kind: input, shape index: {}]   ;;  %s3297_s7 = inlined_call_operand.vmem [shape: bf16[128,128], index: 7, kind: input, shape index: {}]   ;;  %s3298_s8 = inlined_call_operand.vmem [shape: f32[1,128], index: 8, kind: input, shape index: {}]   ;;  %s3299_s9 = inlined_call_operand.vmem [shape: f32[16,128], index: 9, kind: output, shape index: {}]  }
   0x1   :  { %15 = vsyncpa [#allocation5], 0  ;;  %s3089_s30 = smov [#allocation2]  }
   0x2   :  { %s23_s10 = sshll.u32 %s3089_s30, 4  ;;  %s24_s10 = int_to_ptr.vmem [resolvable:$true] %s23_s10 }
   0x3   :  { %s3053_s11 = scalar_lea.vmem %s24_s10, 21952  ;;  %p3058_p1 = scmp.lt.s32.totalorder %s24_s10, %s24_s10 }
   0x4   :  { %p3054_p0 = scmp.ne.s32.totalorder %s24_s10, %s3053_s11  ;;  %p3059_p2 = scmp.lt.s32.totalorder %s3053_s11, %s3053_s11 }
   0x6   :  { %p3060_p3 = por %p3059_p2, %p3058_p1 }
   0x8   :  { %p3061_p4 = pnand %p3060_p3, %p3054_p0 }
   0xa   :  { %3064 = shalt.err (!%p3061_p4)
}
   0xb   :  { %s3090_s12 = smov 448   ;;  %s3091_s13 = smov 28  }
   0xc   :  { %29 = dma.hbm_to_vmem [thread:$0]  %s3291_s1, 21952, %s24_s10, [#allocation3], %s3090_s12, %s3090_s12, %s3091_s13  }
   0xd   :  { %s3092_s16 = smov [#allocation4]  }
   0xe   :  { %s39_s17 = sshll.u32 %s3092_s16, 4  ;;  %s40_s17 = int_to_ptr.vmem [resolvable:$true] %s39_s17 }
   0xf   :  { %s3073_s18 = scalar_lea.vmem %s40_s17, 6272  ;;  %p3078_p6 = scmp.lt.s32.totalorder %s40_s17, %s40_s17 }
  0x10   :  { %p3074_p5 = scmp.ne.s32.totalorder %s40_s17, %s3073_s18  ;;  %p3079_p7 = scmp.lt.s32.totalorder %s3073_s18, %s3073_s18 }
  0x12   :  { %p3080_p8 = por %p3079_p7, %p3078_p6 }
  0x14   :  { %p3081_p9 = pnand %p3080_p8, %p3074_p5 }
  0x16   :  { %3084 = shalt.err (!%p3081_p9)
}
  0x17   :  { %s3093_s19 = smov 64   ;;  %s3094_s20 = smov 4  }
  0x18   :  { %45 = dma.hbm_to_vmem [thread:$0]  %s3294_s4, 6272, %s40_s17, [#allocation5], %s3093_s19, %s3093_s19, %s3094_s20  }
  0x19   :  { %3085 = dma.done.wait [#allocation3], 21952  }
  0x1a   :  { %3086 = vsyncadd [#allocation3], 4294945344 }
  0x1b   :  { %3087 = dma.done.wait [#allocation5], 6272  }
  0x1c   :  { %3088 = vsyncadd [#allocation5], 4294961024  ;;  %v2733_v0 = vld [vmem:[#allocation2 + $0x18c] ss:$28 sps:$4 sm:$0xff]   ;;  %v2739_v4 = vld [vmem:[#allocation2 + $0x154] ss:$28 sps:$4 sm:$0xff]  }
  0x1d   :  { %v2735_v1 = vld [vmem:[#allocation2 + $0x50c] ss:$28 sps:$4 sm:$0xff]   ;;  %1225 = vmatprep.subr.bf16.mxu0 %v2733_v0  ;;  %v2741_v5 = vld [vmem:[#allocation2 + $0x4d4] ss:$28 sps:$4 sm:$0xff]   ;;  %v2745_v8 = vld [vmem:[#allocation2 + $0x11c] ss:$28 sps:$4 sm:$0xff]  }
  0x1e   :  { %v2737_v2 = vld [vmem:[#allocation2 + $0x188] ss:$28 sps:$4 sm:$0xff]   ;;  %1268 = vmatprep.subr.bf16.mxu1 %v2735_v1  ;;  %v2743_v6 = vld [vmem:[#allocation2 + $0x150] ss:$28 sps:$4 sm:$0xff]   ;;  %v2747_v9 = vld [vmem:[#allocation2 + $0x49c] ss:$28 sps:$4 sm:$0xff]  }
  0x1f   :  { %v2738_v3 = vld [vmem:[#allocation2 + $0x508] ss:$28 sps:$4 sm:$0xff]   ;;  %1226 = vmatpush1.bf16.msra.mxu0 %v2737_v2  ;;  %v2744_v7 = vld [vmem:[#allocation2 + $0x4d0] ss:$28 sps:$4 sm:$0xff]   ;;  %v2749_v10 = vld [vmem:[#allocation2 + $0x118] ss:$28 sps:$4 sm:$0xff]  }
  0x20   :  { %1269 = vmatpush1.bf16.msra.mxu1 %v2738_v3  ;;  %1227 = vmatprep.subr.bf16.mxu0 %v2739_v4  ;;  %v2750_v11 = vld [vmem:[#allocation2 + $0x498] ss:$28 sps:$4 sm:$0xff]   ;;  %v2751_v12 = vld [vmem:[#allocation2 + $0xe4] ss:$28 sps:$4 sm:$0xff]   ;;  %v2757_v16 = vld [vmem:[#allocation2 + $0xac] ss:$28 sps:$4 sm:$0xff]  }
  0x21   :  { %1270 = vmatprep.subr.bf16.mxu1 %v2741_v5  ;;  %v2753_v13 = vld [vmem:[#allocation2 + $0x464] ss:$28 sps:$4 sm:$0xff]   ;;  %v2759_v17 = vld [vmem:[#allocation2 + $0x42c] ss:$28 sps:$4 sm:$0xff]   ;;  %v2763_v20 = vld [vmem:[#allocation2 + $0x74] ss:$28 sps:$4 sm:$0xff]  }
  0x22   :  { %v2755_v14 = vld [vmem:[#allocation2 + $0xe0] ss:$28 sps:$4 sm:$0xff]   ;;  %v2761_v18 = vld [vmem:[#allocation2 + $0xa8] ss:$28 sps:$4 sm:$0xff]   ;;  %v2765_v21 = vld [vmem:[#allocation2 + $0x3f4] ss:$28 sps:$4 sm:$0xff]  }
  0x23   :  { %1228 = vmatpush1.bf16.msra.mxu0 %v2743_v6  ;;  %v2756_v15 = vld [vmem:[#allocation2 + $0x460] ss:$28 sps:$4 sm:$0xff]   ;;  %v2762_v19 = vld [vmem:[#allocation2 + $0x428] ss:$28 sps:$4 sm:$0xff]   ;;  %v2767_v22 = vld [vmem:[#allocation2 + $0x70] ss:$28 sps:$4 sm:$0xff]  }
  0x24   :  { %1271 = vmatpush1.bf16.msra.mxu1 %v2744_v7  ;;  %1229 = vmatprep.subr.bf16.mxu0 %v2745_v8  ;;  %v2768_v23 = vld [vmem:[#allocation2 + $0x3f0] ss:$28 sps:$4 sm:$0xff]   ;;  %v2769_v24 = vld [vmem:[#allocation2 + $0x3c] ss:$28 sps:$4 sm:$0xff]   ;;  %v2775_v28 = vld [vmem:[#allocation2 + $0x4] ss:$28 sps:$4 sm:$0xff]  }
  0x25   :  { %1272 = vmatprep.subr.bf16.mxu1 %v2747_v9  ;;  %v2771_v25 = vld [vmem:[#allocation2 + $0x3bc] ss:$28 sps:$4 sm:$0xff]   ;;  %vm1199_vm0 = vcmask 64512   ;;  %v2777_v30 = vld [vmem:[#allocation2 + $0x384] ss:$28 sps:$4 sm:$0xff]   ;;  %vm1203_vm1 = vcmask 1043456  }
  0x26   :  { %v2773_v26 = vld [vmem:[#allocation2 + $0x38] ss:$28 sps:$4 sm:$0xff]   ;;  %v3157_v29 = vld [vmem:[%s3290_s0 + $0xc] ss:$16 sps:$4 sm:$0xff]   ;;  %v257_v31 = vld [vmem:[#allocation2 + $0x540] sm:$0xff]  ;;  %vm3097_vm10 = vmmov 0  }
  0x27   :  { %1230 = vmatpush1.bf16.msra.mxu0 %v2749_v10  ;;  %v2774_v27 = vld [vmem:[#allocation2 + $0x3b8] ss:$28 sps:$4 sm:$0xff]   ;;  %2532 = vmatprep.mubr.msk.bf16.mxu1 %vm1199_vm0, %v3157_v29  ;;  %v2779_v32 = vld [vmem:[#allocation2] ss:$28 sps:$4 sm:$0xff]   ;;  %v2781_v34 = vld [vmem:[#allocation2 + $0x34c] ss:$28 sps:$4 sm:$0xff]   ;;  %v2525_v35 = vcombine.high %v257_v31, %v257_v31  ;;  %v2524_v36 = vcombine.low %v257_v31, %v257_v31 }
  0x28   :  { %1273 = vmatpush1.bf16.msra.mxu1 %v2750_v11  ;;  %1231 = vmatprep.subr.bf16.mxu0 %v2751_v12  ;;  %v2780_v33 = vld [vmem:[#allocation2 + $0x380] ss:$28 sps:$4 sm:$0xff]   ;;  %v2784_v37 = vld [vmem:[#allocation2 + $0x348] ss:$28 sps:$4 sm:$0xff]   ;;  %v2786_v38 = vld [vmem:[#allocation2 + $0x314] ss:$28 sps:$4 sm:$0xff]  }
  0x29   :  { %1274 = vmatprep.subr.bf16.mxu1 %v2753_v13  ;;  %v1205_v39 = vsel %vm1203_vm1, %v2524_v36, 0  ;;  %v2792_v40 = vld [vmem:[#allocation2 + $0x194] ss:$28 sps:$4 sm:$0xff]   ;;  %v3166_v42 = vld [vmem:[%s3290_s0 + $0x8] ss:$16 sps:$4 sm:$0xff]  }
  0x2a   :  { %v2790_v41 = vld [vmem:[#allocation2 + $0x190] ss:$28 sps:$4 sm:$0xff]   ;;  %v2795_v44 = vld [vmem:[#allocation2 + $0x2dc] ss:$28 sps:$4 sm:$0xff]   ;;  %v2801_v48 = vld [vmem:[#allocation2 + $0x2a4] ss:$28 sps:$4 sm:$0xff]  }
  0x2b   :  { %1232 = vmatpush1.bf16.msra.mxu0 %v2755_v14  ;;  %v2793_v43 = vld [vmem:[#allocation2 + $0x310] ss:$28 sps:$4 sm:$0xff]   ;;  %v2799_v45 = vld [vmem:[#allocation2 + $0x15c] ss:$28 sps:$4 sm:$0xff]   ;;  %v2805_v49 = vld [vmem:[#allocation2 + $0x124] ss:$28 sps:$4 sm:$0xff]  }
  0x2c   :  { %1275 = vmatpush1.bf16.msra.mxu1 %v2756_v15  ;;  %1233 = vmatprep.subr.bf16.mxu0 %v2757_v16  ;;  %v2797_v46 = vld [vmem:[#allocation2 + $0x158] ss:$28 sps:$4 sm:$0xff]   ;;  %v2803_v50 = vld [vmem:[#allocation2 + $0x120] ss:$28 sps:$4 sm:$0xff]   ;;  %v2807_v53 = vld [vmem:[#allocation2 + $0x26c] ss:$28 sps:$4 sm:$0xff]  }
  0x2d   :  { %1276 = vmatprep.subr.bf16.mxu1 %v2759_v17  ;;  %v2800_v47 = vld [vmem:[#allocation2 + $0x2d8] ss:$28 sps:$4 sm:$0xff]   ;;  %v2806_v52 = vld [vmem:[#allocation2 + $0x2a0] ss:$28 sps:$4 sm:$0xff]   ;;  %v2811_v54 = vld [vmem:[#allocation2 + $0xec] ss:$28 sps:$4 sm:$0xff]  }
  0x2e   :  { %v3172_v51 = vld [vmem:[%s3290_s0 + $0x4] ss:$16 sps:$4 sm:$0xff]   ;;  %v2815_v59 = vld [vmem:[#allocation2 + $0xb0] ss:$28 sps:$4 sm:$0xff]   ;;  %v2819_v61 = vld [vmem:[#allocation2 + $0x1fc] ss:$28 sps:$4 sm:$0xff]  }
  0x2f   :  { %1234 = vmatpush1.bf16.msra.mxu0 %v2761_v18  ;;  %1257 = vmatprep.mubr.bf16.mxu0 %v3172_v51  ;;  %v2809_v55 = vld [vmem:[#allocation2 + $0xe8] ss:$28 sps:$4 sm:$0xff]   ;;  %v2813_v57 = vld [vmem:[#allocation2 + $0x234] ss:$28 sps:$4 sm:$0xff]   ;;  %v2823_v62 = vld [vmem:[#allocation2 + $0x7c] ss:$28 sps:$4 sm:$0xff]  }
  0x30   :  { %1277 = vmatpush1.bf16.msra.mxu1 %v2762_v19  ;;  %1235 = vmatprep.subr.bf16.mxu0 %v2763_v20  ;;  %v2812_v56 = vld [vmem:[#allocation2 + $0x268] ss:$28 sps:$4 sm:$0xff]   ;;  %v2817_v58 = vld [vmem:[#allocation2 + $0xb4] ss:$28 sps:$4 sm:$0xff]   ;;  %v2827_v3 = vld [vmem:[#allocation2 + $0x40] ss:$28 sps:$4 sm:$0xff]  }
  0x31   :  { %1278 = vmatprep.subr.bf16.mxu1 %v2765_v21  ;;  %v2818_v60 = vld [vmem:[#allocation2 + $0x230] ss:$28 sps:$4 sm:$0xff]   ;;  %v2821_v63 = vld [vmem:[#allocation2 + $0x78] ss:$28 sps:$4 sm:$0xff]   ;;  %v2825_v1 = vld [vmem:[#allocation2 + $0x1c4] ss:$28 sps:$4 sm:$0xff]  }
  0x32   :  { %v2824_v0 = vld [vmem:[#allocation2 + $0x1f8] ss:$28 sps:$4 sm:$0xff]   ;;  %v2829_v2 = vld [vmem:[#allocation2 + $0x44] ss:$28 sps:$4 sm:$0xff]   ;;  %v2836_v5 = vld [vmem:[#allocation2 + $0xc] ss:$28 sps:$4 sm:$0xff]  }
  0x33   :  { %1236 = vmatpush1.bf16.msra.mxu0 %v2767_v22  ;;  %v2830_v4 = vld [vmem:[#allocation2 + $0x1c0] ss:$28 sps:$4 sm:$0xff]   ;;  %v2839_v6 = vld [vmem:[#allocation2 + $0x514] ss:$28 sps:$4 sm:$0xff]   ;;  %v2834_v8 = vld [vmem:[#allocation2 + $0x8] ss:$28 sps:$4 sm:$0xff]  }
  0x34   :  { %1279 = vmatpush1.bf16.msra.mxu1 %v2768_v23  ;;  %1237 = vmatprep.subr.bf16.mxu0 %v2769_v24  ;;  %v3179_v7 = vld [vmem:[%s3290_s0] ss:$16 sps:$4 sm:$0xff]   ;;  %v2845_v11 = vld [vmem:[#allocation2 + $0x4dc] ss:$28 sps:$4 sm:$0xff]   ;;  %v2857_v19 = vld [vmem:[#allocation2 + $0x46c] ss:$28 sps:$4 sm:$0xff]  }
  0x35   :  { %1280 = vmatprep.subr.bf16.mxu1 %v2771_v25  ;;  %v2837_v9 = vld [vmem:[#allocation2 + $0x510] ss:$28 sps:$4 sm:$0xff]   ;;  %v2843_v13 = vld [vmem:[#allocation2 + $0x4d8] ss:$28 sps:$4 sm:$0xff]   ;;  %v2851_v15 = vld [vmem:[#allocation2 + $0x4a4] ss:$28 sps:$4 sm:$0xff]  }
  0x36   :  { %v2842_v10 = vld [vmem:[#allocation2 + $0x354] ss:$28 sps:$4 sm:$0xff]   ;;  %v2848_v14 = vld [vmem:[#allocation2 + $0x31c] ss:$28 sps:$4 sm:$0xff]   ;;  %v2854_v18 = vld [vmem:[#allocation2 + $0x2e4] ss:$28 sps:$4 sm:$0xff]  }
  0x37   :  { %1238 = vmatpush1.bf16.msra.mxu0 %v2773_v26  ;;  %v2840_v12 = vld [vmem:[#allocation2 + $0x350] ss:$28 sps:$4 sm:$0xff]   ;;  %v2846_v16 = vld [vmem:[#allocation2 + $0x318] ss:$28 sps:$4 sm:$0xff]   ;;  %v2849_v17 = vld [vmem:[#allocation2 + $0x4a0] ss:$28 sps:$4 sm:$0xff]  }
  0x38   :  { %1281 = vmatpush1.bf16.msra.mxu1 %v2774_v27  ;;  %1239 = vmatprep.subr.bf16.mxu0 %v2775_v28  ;;  %v2852_v20 = vld [vmem:[#allocation2 + $0x2e0] ss:$28 sps:$4 sm:$0xff]   ;;  %v2855_v21 = vld [vmem:[#allocation2 + $0x468] ss:$28 sps:$4 sm:$0xff]   ;;  %v2863_v23 = vld [vmem:[#allocation2 + $0x434] ss:$28 sps:$4 sm:$0xff]  }
  0x39   :  { %1282 = vmatprep.subr.bf16.mxu1 %v2777_v30  ;;  %v2860_v22 = vld [vmem:[#allocation2 + $0x2ac] ss:$28 sps:$4 sm:$0xff]   ;;  %v2866_v26 = vld [vmem:[#allocation2 + $0x274] ss:$28 sps:$4 sm:$0xff]   ;;  %v2869_v27 = vld [vmem:[#allocation2 + $0x3fc] ss:$28 sps:$4 sm:$0xff]  }
  0x3a   :  { %v2858_v24 = vld [vmem:[#allocation2 + $0x2a8] ss:$28 sps:$4 sm:$0xff]   ;;  %v2861_v25 = vld [vmem:[#allocation2 + $0x430] ss:$28 sps:$4 sm:$0xff]   ;;  %v2867_v30 = vld [vmem:[#allocation2 + $0x3f8] ss:$28 sps:$4 sm:$0xff]  }
  0x3b   :  { %1240 = vmatpush1.bf16.msra.mxu0 %v2779_v32  ;;  %v2864_v28 = vld [vmem:[#allocation2 + $0x270] ss:$28 sps:$4 sm:$0xff]   ;;  %v2872_v31 = vld [vmem:[#allocation2 + $0x23c] ss:$28 sps:$4 sm:$0xff]   ;;  %v2875_v32 = vld [vmem:[#allocation2 + $0x3c4] ss:$28 sps:$4 sm:$0xff]  }
  0x3c   :  { %1283 = vmatpush1.bf16.msra.mxu1 %v2780_v33  ;;  %1241 = vmatprep.subr.bf16.mxu0 %v2781_v34  ;;  %v2870_v33 = vld [vmem:[#allocation2 + $0x238] ss:$28 sps:$4 sm:$0xff]   ;;  %v2873_v34 = vld [vmem:[#allocation2 + $0x3c0] ss:$28 sps:$4 sm:$0xff]   ;;  %v2881_v36 = vld [vmem:[#allocation2 + $0x38c] ss:$28 sps:$4 sm:$0xff]  }
  0x3d   :  { %2531 = vmatprep.subr.msk.bf16.mxu1 %vm1203_vm1, %v2525_v35  ;;  %v2878_v35 = vld [vmem:[#allocation2 + $0x204] ss:$28 sps:$4 sm:$0xff]  }
  0x3f   :  { %1242 = vmatpush2.bf16.msra.mxu0 %v2784_v37  ;;  %v258_v37 = vld [vmem:[#allocation2 + $0x548] sm:$0xff] }
  0x40   :  { %1299 = vmatpush2.bf16.msra.mxu1 %v1205_v39  ;;  %1243 = vmatprep.subr.bf16.mxu0 %v2786_v38  ;;  %v2876_v38 = vld [vmem:[#allocation2 + $0x200] ss:$28 sps:$4 sm:$0xff]   ;;  %v2879_v39 = vld [vmem:[#allocation2 + $0x388] ss:$28 sps:$4 sm:$0xff]  }
  0x41   :  { %1311 = vmatprep.subr.bf16.mxu1 %v2792_v40  ;;  %v2884_v40 = vld [vmem:[#allocation2 + $0x1cc] ss:$28 sps:$4 sm:$0xff]  }
  0x43   :  { %1301 = vmatmul.mubr.bf16.vlgmr.msra.gmra.mxu1 %v3166_v42  ;;  %1244 = vmatpush2.bf16.msra.mxu0 %v2793_v43  ;;  %v2526_v43 = vcombine.low %v258_v37, %v258_v37 }
  0x44   :  { %1312 = vmatpush1.bf16.msra.mxu1 %v2790_v41  ;;  %1245 = vmatprep.subr.bf16.mxu0 %v2795_v44  ;;  %v2527_v41 = vcombine.high %v258_v37, %v258_v37  ;;  %v2882_v44 = vld [vmem:[#allocation2 + $0x1c8] ss:$28 sps:$4 sm:$0xff]   ;;  %v2969_v37 = vld [vmem:[#allocation2 + $0xf8] ss:$28 sps:$4 sm:$0xff]  }
  0x45   :  { %1313 = vmatprep.subr.bf16.mxu1 %v2799_v45  ;;  %1343 = vmatprep.mubr.bf16.mxu1 %v3172_v51  ;;  %v2889_v45 = vld [vmem:[#allocation2 + $0x19c] ss:$28 sps:$4 sm:$0xff]  }
  0x47   :  { %1246 = vmatpush2.bf16.msra.mxu0 %v2800_v47  ;;  %v2907_v47 = vld [vmem:[#allocation2 + $0x51c] ss:$28 sps:$4 sm:$0xff]  }
  0x48   :  { %1314 = vmatpush1.bf16.msra.mxu1 %v2797_v46  ;;  %1247 = vmatprep.subr.bf16.mxu0 %v2801_v48  ;;  %v1211_v46 = vsel %vm1203_vm1, %v2526_v43, 0  ;;  %v2887_v48 = vld [vmem:[#allocation2 + $0x198] ss:$28 sps:$4 sm:$0xff]   ;;  %v2974_v43 = vld [vmem:[#allocation2 + $0x248] ss:$28 sps:$4 sm:$0xff]  }
  0x49   :  { %1315 = vmatprep.subr.bf16.mxu1 %v2805_v49  ;;  %v2905_v49 = vld [vmem:[#allocation2 + $0x518] ss:$28 sps:$4 sm:$0xff]  }
  0x4b   :  { %1248 = vmatpush2.bf16.msra.mxu0 %v2806_v52  ;;  %v2913_v52 = vld [vmem:[#allocation2 + $0x4e4] ss:$28 sps:$4 sm:$0xff]  }
  0x4c   :  { %1316 = vmatpush1.bf16.msra.mxu1 %v2803_v50  ;;  %1249 = vmatprep.subr.bf16.mxu0 %v2807_v53  ;;  %v2892_v50 = vld [vmem:[#allocation2 + $0x164] ss:$28 sps:$4 sm:$0xff]  }
  0x4d   :  { %1317 = vmatprep.subr.bf16.mxu1 %v2811_v54  ;;  %v2890_v53 = vld [vmem:[#allocation2 + $0x160] ss:$28 sps:$4 sm:$0xff]   ;;  %v2895_v54 = vld [vmem:[#allocation2 + $0x12c] ss:$28 sps:$4 sm:$0xff]  }
  0x4f   :  { %1250 = vmatpush2.bf16.msra.mxu0 %v2812_v56  ;;  %v2919_v56 = vld [vmem:[#allocation2 + $0x4ac] ss:$28 sps:$4 sm:$0xff]  }
  0x50   :  { %1318 = vmatpush1.bf16.msra.mxu1 %v2809_v55  ;;  %1251 = vmatprep.subr.bf16.mxu0 %v2813_v57  ;;  %v2911_v55 = vld [vmem:[#allocation2 + $0x4e0] ss:$28 sps:$4 sm:$0xff]   ;;  %v2893_v57 = vld [vmem:[#allocation2 + $0x128] ss:$28 sps:$4 sm:$0xff]  }
  0x51   :  { %1319 = vmatprep.subr.bf16.mxu1 %v2817_v58  ;;  %v2898_v58 = vld [vmem:[#allocation2 + $0xf4] ss:$28 sps:$4 sm:$0xff]  }
  0x53   :  { %1252 = vmatpush2.bf16.msra.mxu0 %v2818_v60  ;;  %v2925_v60 = vld [vmem:[#allocation2 + $0x474] ss:$28 sps:$4 sm:$0xff]  }
  0x54   :  { %1320 = vmatpush1.bf16.msra.mxu1 %v2815_v59  ;;  %1253 = vmatprep.subr.bf16.mxu0 %v2819_v61  ;;  %v2917_v59 = vld [vmem:[#allocation2 + $0x4a8] ss:$28 sps:$4 sm:$0xff]   ;;  %v2896_v61 = vld [vmem:[#allocation2 + $0xf0] ss:$28 sps:$4 sm:$0xff]  }
  0x55   :  { %1321 = vmatprep.subr.bf16.mxu1 %v2823_v62  ;;  %v2901_v62 = vld [vmem:[#allocation2 + $0xbc] ss:$28 sps:$4 sm:$0xff]  }
  0x57   :  { %1254 = vmatpush2.bf16.msra.mxu0 %v2824_v0  ;;  %v2931_v0 = vld [vmem:[#allocation2 + $0x43c] ss:$28 sps:$4 sm:$0xff]  }
  0x58   :  { %1322 = vmatpush1.bf16.msra.mxu1 %v2821_v63  ;;  %1255 = vmatprep.subr.bf16.mxu0 %v2825_v1  ;;  %v2923_v63 = vld [vmem:[#allocation2 + $0x470] ss:$28 sps:$4 sm:$0xff]   ;;  %v2899_v1 = vld [vmem:[#allocation2 + $0xb8] ss:$28 sps:$4 sm:$0xff]  }
  0x59   :  { %1323 = vmatprep.subr.bf16.mxu1 %v2829_v2  ;;  %v2904_v2 = vld [vmem:[#allocation2 + $0x84] ss:$28 sps:$4 sm:$0xff]  }
  0x5b   :  { %1256 = vmatpush2.bf16.msra.mxu0 %v2830_v4  ;;  %v2902_v4 = vld [vmem:[#allocation2 + $0x80] ss:$28 sps:$4 sm:$0xff]  }
  0x5c   :  { %1324 = vmatpush1.bf16.msra.mxu1 %v2827_v3  ;;  %1354 = vmatprep.subr.bf16.mxu0 %v2839_v6  ;;  %v2937_v3 = vld [vmem:[#allocation2 + $0x404] ss:$28 sps:$4 sm:$0xff]  }
  0x5d   :  { %1325 = vmatprep.subr.bf16.mxu1 %v2836_v5  ;;  %v2910_v5 = vld [vmem:[#allocation2 + $0x4c] ss:$28 sps:$4 sm:$0xff]   ;;  %v2935_v6 = vld [vmem:[#allocation2 + $0x400] ss:$28 sps:$4 sm:$0xff]  }
  0x5e   :  { %1258 = vmatmul.mubr.bf16.vlgmr.msra.gmra.mxu0 %v3179_v7 }
  0x5f   :  { %1355 = vmatpush1.bf16.msra.mxu0 %v2837_v9  ;;  %2534 = vmatprep.mubr.msk.bf16.mxu0 %vm1199_vm0, %v3157_v29  ;;  %v2908_v9 = vld [vmem:[#allocation2 + $0x48] ss:$28 sps:$4 sm:$0xff]  }
  0x60   :  { %1326 = vmatpush1.bf16.msra.mxu1 %v2834_v8  ;;  %1356 = vmatprep.subr.bf16.mxu0 %v2845_v11  ;;  %v2943_v8 = vld [vmem:[#allocation2 + $0x3cc] ss:$28 sps:$4 sm:$0xff]  }
  0x61   :  { %1327 = vmatprep.subr.bf16.mxu1 %v2842_v10  ;;  %v2916_v10 = vld [vmem:[#allocation2 + $0x14] ss:$28 sps:$4 sm:$0xff]   ;;  %v2941_v11 = vld [vmem:[#allocation2 + $0x3c8] ss:$28 sps:$4 sm:$0xff]  }
  0x63   :  { %1357 = vmatpush1.bf16.msra.mxu0 %v2843_v13  ;;  %v259_v13 = vld [vmem:[#allocation2 + $0x550] sm:$0xff] }
  0x64   :  { %1328 = vmatpush2.bf16.msra.mxu1 %v2840_v12  ;;  %1358 = vmatprep.subr.bf16.mxu0 %v2851_v15  ;;  %v2949_v12 = vld [vmem:[#allocation2 + $0x394] ss:$28 sps:$4 sm:$0xff]  }
  0x65   :  { %1329 = vmatprep.subr.bf16.mxu1 %v2848_v14  ;;  %v2914_v14 = vld [vmem:[#allocation2 + $0x10] ss:$28 sps:$4 sm:$0xff]  }
  0x66   :  { %v2947_v15 = vld [vmem:[#allocation2 + $0x390] ss:$28 sps:$4 sm:$0xff]  }
  0x67   :  { %1359 = vmatpush1.bf16.msra.mxu0 %v2849_v17  ;;  %v2529_v17 = vcombine.high %v259_v13, %v259_v13 }
  0x68   :  { %1330 = vmatpush2.bf16.msra.mxu1 %v2846_v16  ;;  %1360 = vmatprep.subr.bf16.mxu0 %v2857_v19  ;;  %v2922_v16 = vld [vmem:[#allocation2 + $0x35c] ss:$28 sps:$4 sm:$0xff]  }
  0x69   :  { %1331 = vmatprep.subr.bf16.mxu1 %v2854_v18  ;;  %v2528_v18 = vcombine.low %v259_v13, %v259_v13  ;;  %v2920_v19 = vld [vmem:[#allocation2 + $0x358] ss:$28 sps:$4 sm:$0xff]   ;;  %v3001_v13 = vld [vmem:[#allocation4] sm:$0xff]  }
  0x6b   :  { %1361 = vmatpush1.bf16.msra.mxu0 %v2855_v21  ;;  %v1217_v21 = vsel %vm1203_vm1, %v2528_v18, 0  ;;  %v3004_v18 = vld [vmem:[#allocation4 + $0xf0] sm:$0xff]  }
  0x6c   :  { %1332 = vmatpush2.bf16.msra.mxu1 %v2852_v20  ;;  %1362 = vmatprep.subr.bf16.mxu0 %v2863_v23  ;;  %v2928_v20 = vld [vmem:[#allocation2 + $0x324] ss:$28 sps:$4 sm:$0xff]  }
  0x6d   :  { %1333 = vmatprep.subr.bf16.mxu1 %v2860_v22  ;;  %v2958_v22 = vld [vmem:[#allocation2 + $0x360] ss:$28 sps:$4 sm:$0xff]  }
  0x6e   :  { %v2926_v23 = vld [vmem:[#allocation2 + $0x320] ss:$28 sps:$4 sm:$0xff]  }
  0x6f   :  { %1363 = vmatpush1.bf16.msra.mxu0 %v2861_v25  ;;  %v2959_v25 = vld [vmem:[#allocation2 + $0x1a0] ss:$28 sps:$4 sm:$0xff]  }
  0x70   :  { %1334 = vmatpush2.bf16.msra.mxu1 %v2858_v24  ;;  %1364 = vmatprep.subr.bf16.mxu0 %v2869_v27  ;;  %v2934_v24 = vld [vmem:[#allocation2 + $0x2ec] ss:$28 sps:$4 sm:$0xff]  }
  0x71   :  { %1335 = vmatprep.subr.bf16.mxu1 %v2866_v26  ;;  %v2963_v26 = vld [vmem:[#allocation2 + $0x328] ss:$28 sps:$4 sm:$0xff]  }
  0x72   :  { %v2932_v27 = vld [vmem:[#allocation2 + $0x2e8] ss:$28 sps:$4 sm:$0xff]  }
  0x73   :  { %1365 = vmatpush1.bf16.msra.mxu0 %v2867_v30  ;;  %v2964_v30 = vld [vmem:[#allocation2 + $0x168] ss:$28 sps:$4 sm:$0xff]  }
  0x74   :  { %1336 = vmatpush2.bf16.msra.mxu1 %v2864_v28  ;;  %1366 = vmatprep.subr.bf16.mxu0 %v2875_v32  ;;  %v2940_v28 = vld [vmem:[#allocation2 + $0x2b4] ss:$28 sps:$4 sm:$0xff]  }
  0x75   :  { %1337 = vmatprep.subr.bf16.mxu1 %v2872_v31  ;;  %v2965_v31 = vld [vmem:[#allocation2 + $0x2f0] ss:$28 sps:$4 sm:$0xff]  }
  0x76   :  { %v2938_v32 = vld [vmem:[#allocation2 + $0x2b0] ss:$28 sps:$4 sm:$0xff]  }
  0x77   :  { %1367 = vmatpush1.bf16.msra.mxu0 %v2873_v34  ;;  %v2966_v34 = vld [vmem:[#allocation2 + $0x130] ss:$28 sps:$4 sm:$0xff]  }
  0x78   :  { %1338 = vmatpush2.bf16.msra.mxu1 %v2870_v33  ;;  %1368 = vmatprep.subr.bf16.mxu0 %v2881_v36  ;;  %v2946_v33 = vld [vmem:[#allocation2 + $0x27c] ss:$28 sps:$4 sm:$0xff]  }
  0x79   :  { %1339 = vmatprep.subr.bf16.mxu1 %v2878_v35  ;;  %v2968_v35 = vld [vmem:[#allocation2 + $0x2b8] ss:$28 sps:$4 sm:$0xff]  }
  0x7a   :  { %v2944_v36 = vld [vmem:[#allocation2 + $0x278] ss:$28 sps:$4 sm:$0xff]  }
  0x7b   :  { %1369 = vmatpush1.bf16.msra.mxu0 %v2879_v39  ;;  %v2950_v39 = vld [vmem:[#allocation2 + $0x240] ss:$28 sps:$4 sm:$0xff]  }
  0x7c   :  { %1340 = vmatpush2.bf16.msra.mxu1 %v2876_v38  ;;  %2533 = vmatprep.subr.msk.bf16.mxu0 %vm1203_vm1, %v2527_v41  ;;  %v2971_v38 = vld [vmem:[#allocation2 + $0x280] ss:$28 sps:$4 sm:$0xff]  }
  0x7d   :  { %1341 = vmatprep.subr.bf16.mxu1 %v2884_v40  ;;  %v2957_v40 = vld [vmem:[#allocation2 + $0x20c] ss:$28 sps:$4 sm:$0xff]   ;;  %v2972_v41 = vld [vmem:[#allocation2 + $0xc0] ss:$28 sps:$4 sm:$0xff]  }
  0x7f   :  { %1385 = vmatpush2.bf16.msra.mxu0 %v1211_v46  ;;  %v2977_v46 = vld [vmem:[#allocation2 + $0x210] ss:$28 sps:$4 sm:$0xff]  }
  0x80   :  { %1342 = vmatpush2.bf16.msra.mxu1 %v2882_v44  ;;  %1397 = vmatprep.subr.bf16.mxu0 %v2889_v45  ;;  %v2975_v44 = vld [vmem:[#allocation2 + $0x88] ss:$28 sps:$4 sm:$0xff]   ;;  %v2962_v45 = vld [vmem:[#allocation2 + $0x1d4] ss:$28 sps:$4 sm:$0xff]  }
  0x81   :  { %1440 = vmatprep.subr.bf16.mxu1 %v2907_v47  ;;  %v2960_v47 = vld [vmem:[#allocation2 + $0x1d0] ss:$28 sps:$4 sm:$0xff]  }
  0x82   :  { %1387 = vmatmul.mubr.bf16.vlgmr.msra.gmra.mxu0 %v3166_v42 }
  0x83   :  { %1344 = vmatmul.mubr.bf16.vlgmr.msra.gmra.mxu1 %v3179_v7  ;;  %1398 = vmatpush1.bf16.msra.mxu0 %v2887_v48  ;;  %v2978_v48 = vld [vmem:[#allocation2 + $0x50] ss:$28 sps:$4 sm:$0xff]  }
  0x84   :  { %1441 = vmatpush1.bf16.msra.mxu1 %v2905_v49  ;;  %1399 = vmatprep.subr.bf16.mxu0 %v2892_v50  ;;  %v2980_v49 = vld [vmem:[#allocation2 + $0x1d8] ss:$28 sps:$4 sm:$0xff]   ;;  %v2967_v50 = vld [vmem:[#allocation2 + $0x520] ss:$28 sps:$4 sm:$0xff]  }
  0x85   :  { %1442 = vmatprep.subr.bf16.mxu1 %v2913_v52  ;;  %2536 = vmatprep.mubr.msk.bf16.mxu1 %vm1199_vm0, %v3157_v29  ;;  %v2929_v29 = vld [vmem:[#allocation2 + $0x438] ss:$28 sps:$4 sm:$0xff]  }
  0x86   :  { %1429 = vmatprep.mubr.bf16.mxu0 %v3172_v51  ;;  %v2981_v52 = vld [vmem:[#allocation2 + $0x18] ss:$28 sps:$4 sm:$0xff]  }
  0x87   :  { %1400 = vmatpush1.bf16.msra.mxu0 %v2890_v53  ;;  %v2986_v53 = vld [vmem:[#allocation4 + $0x78] sm:$0xff]  }
  0x88   :  { %1443 = vmatpush1.bf16.msra.mxu1 %v2911_v55  ;;  %1401 = vmatprep.subr.bf16.mxu0 %v2895_v54  ;;  %v3095_v54 = vmov 0   ;;  %v2970_v55 = vld [vmem:[#allocation2 + $0x4e8] ss:$28 sps:$4 sm:$0xff]  }
  0x89   :  { %1444 = vmatprep.subr.bf16.mxu1 %v2919_v56  ;;  %v2987_v56 = vld [vmem:[#allocation4 + $0x38] sm:$0xff]  }
  0x8b   :  { %1402 = vmatpush1.bf16.msra.mxu0 %v2893_v57  ;;  %v2988_v57 = vld [vmem:[#allocation4 + $0x70] sm:$0xff]  }
  0x8c   :  { %1445 = vmatpush1.bf16.msra.mxu1 %v2917_v59  ;;  %1403 = vmatprep.subr.bf16.mxu0 %v2898_v58  ;;  %v3043_v58 = vld [vmem:[%s3290_s0 + $0xc] ss:$16 sps:$4 sm:$0xff]  }
  0x8d   :  { %1446 = vmatprep.subr.bf16.mxu1 %v2925_v60  ;;  %v2973_v59 = vld [vmem:[#allocation2 + $0x4b0] ss:$28 sps:$4 sm:$0xff]  }
  0x8e   :  { %v2989_v60 = vld [vmem:[#allocation4 + $0x30] sm:$0xff]  }
  0x8f   :  { %1404 = vmatpush1.bf16.msra.mxu0 %v2896_v61  ;;  %v2990_v61 = vld [vmem:[#allocation4 + $0x68] sm:$0xff]  }
  0x90   :  { %1447 = vmatpush1.bf16.msra.mxu1 %v2923_v63  ;;  %1405 = vmatprep.subr.bf16.mxu0 %v2901_v62  ;;  %v2976_v62 = vld [vmem:[#allocation2 + $0x478] ss:$28 sps:$4 sm:$0xff]   ;;  %v2991_v63 = vld [vmem:[#allocation4 + $0x28] sm:$0xff]  }
  0x91   :  { %1448 = vmatprep.subr.bf16.mxu1 %v2931_v0  ;;  %v2992_v0 = vld [vmem:[#allocation4 + $0x60] sm:$0xff]  }
  0x93   :  { %1406 = vmatpush1.bf16.msra.mxu0 %v2899_v1  ;;  %v2979_v1 = vld [vmem:[#allocation2 + $0x440] ss:$28 sps:$4 sm:$0xff]  }
  0x94   :  { %1449 = vmatpush1.bf16.msra.mxu1 %v2929_v29  ;;  %1407 = vmatprep.subr.bf16.mxu0 %v2904_v2  ;;  %v2993_v2 = vld [vmem:[#allocation4 + $0x20] sm:$0xff]   ;;  %v2982_v29 = vld [vmem:[#allocation2 + $0x408] ss:$28 sps:$4 sm:$0xff]  }
  0x95   :  { %1450 = vmatprep.subr.bf16.mxu1 %v2937_v3  ;;  %v2995_v3 = vld [vmem:[#allocation4 + $0x18] sm:$0xff]  }
  0x97   :  { %1408 = vmatpush1.bf16.msra.mxu0 %v2902_v4  ;;  %v2996_v4 = vld [vmem:[#allocation4 + $0x50] sm:$0xff]  }
  0x98   :  { %1451 = vmatpush1.bf16.msra.mxu1 %v2935_v6  ;;  %1409 = vmatprep.subr.bf16.mxu0 %v2910_v5  ;;  %v2983_v5 = vld [vmem:[#allocation2 + $0x3d0] ss:$28 sps:$4 sm:$0xff]  }
  0x99   :  { %1452 = vmatprep.subr.bf16.mxu1 %v2943_v8  ;;  %v2997_v6 = vld [vmem:[#allocation4 + $0x10] sm:$0xff]   ;;  %v2998_v8 = vld [vmem:[#allocation4 + $0x48] sm:$0xff]  }
  0x9b   :  { %1410 = vmatpush1.bf16.msra.mxu0 %v2908_v9  ;;  %v2984_v9 = vld [vmem:[#allocation2 + $0x398] ss:$28 sps:$4 sm:$0xff]  }
  0x9c   :  { %1453 = vmatpush1.bf16.msra.mxu1 %v2941_v11  ;;  %1411 = vmatprep.subr.bf16.mxu0 %v2916_v10  ;;  %v2999_v10 = vld [vmem:[#allocation4 + $0x8] sm:$0xff]   ;;  %v2985_v11 = vld [vmem:[#allocation2 + $0x558] ss:$0 sps:$4 sm:$0xff]  }
  0x9d   :  { %1454 = vmatprep.subr.bf16.mxu1 %v2949_v12  ;;  %v3000_v12 = vld [vmem:[#allocation4 + $0x40] sm:$0xff]  }
  0x9f   :  { %1412 = vmatpush1.bf16.msra.mxu0 %v2914_v14  ;;  %v1223_v14 = vsel %vm1203_vm1, %v2985_v11, 0  ;;  %v3024_v11 = vld [vmem:[#allocation4 + $0x160] sm:$0xff]  }
  0xa0   :  { %1455 = vmatpush1.bf16.msra.mxu1 %v2947_v15  ;;  %1413 = vmatprep.subr.bf16.mxu0 %v2922_v16  ;;  %v3002_v15 = vld [vmem:[#allocation4 + $0xf8] sm:$0xff]  }
  0xa1   :  { %2535 = vmatprep.subr.msk.bf16.mxu1 %vm1203_vm1, %v2529_v17  ;;  %v3018_v16 = vld [vmem:[#allocation4 + $0x178] sm:$0xff]   ;;  %vm2050_vm1 = vcmask 130048  }
  0xa2   :  { %v3003_v17 = vld [vmem:[#allocation4 + $0xb8] sm:$0xff]  }
  0xa3   :  { %1414 = vmatpush2.bf16.msra.mxu0 %v2920_v19  ;;  %v3044_v19 = vld [vmem:[%s3290_s0 + $0x8] ss:$16 sps:$4 sm:$0xff]  }
  0xa4   :  { %1471 = vmatpush2.bf16.msra.mxu1 %v1217_v21  ;;  %1415 = vmatprep.subr.bf16.mxu0 %v2928_v20  ;;  %v3005_v20 = vld [vmem:[#allocation4 + $0xb0] sm:$0xff]   ;;  %v3006_v21 = vld [vmem:[#allocation4 + $0xe8] sm:$0xff]  }
  0xa5   :  { %2599 = vmatprep.subr.bf16.mxu1 %v2958_v22  ;;  %v3007_v22 = vld [vmem:[#allocation4 + $0xa8] sm:$0xff]  }
  0xa7   :  { %1473 = vmatmul.mubr.bf16.vlgmr.msra.gmra.mxu1 %v3166_v42  ;;  %1416 = vmatpush2.bf16.msra.mxu0 %v2926_v23  ;;  %v2952_v42 = vld [vmem:[#allocation2 + $0x244] ss:$28 sps:$4 sm:$0xff]  }
  0xa8   :  { %2600 = vmatpush3.bf16.msra.mxu1 %v2959_v25  ;;  %1417 = vmatprep.subr.bf16.mxu0 %v2934_v24  ;;  %v3008_v23 = vld [vmem:[#allocation4 + $0xe0] sm:$0xff]   ;;  %v3010_v25 = vld [vmem:[#allocation4 + $0xd8] sm:$0xff]  }
  0xa9   :  { %2601 = vmatprep.subr.bf16.mxu1 %v2963_v26  ;;  %1515 = vmatprep.mubr.bf16.mxu1 %v3172_v51  ;;  %v2955_v51 = vld [vmem:[#allocation2 + $0x208] ss:$28 sps:$4 sm:$0xff]   ;;  %v3009_v24 = vld [vmem:[#allocation4 + $0xa0] sm:$0xff]   ;;  %v3011_v26 = vld [vmem:[#allocation4 + $0x98] sm:$0xff]  }
  0xab   :  { %1418 = vmatpush2.bf16.msra.mxu0 %v2932_v27  ;;  %v3012_v27 = vld [vmem:[#allocation4 + $0xd0] sm:$0xff]  }
  0xac   :  { %2602 = vmatpush3.bf16.msra.mxu1 %v2964_v30  ;;  %1419 = vmatprep.subr.bf16.mxu0 %v2940_v28  ;;  %v3013_v28 = vld [vmem:[#allocation4 + $0x90] sm:$0xff]   ;;  %v3014_v30 = vld [vmem:[#allocation4 + $0xc8] sm:$0xff]  }
  0xad   :  { %2603 = vmatprep.subr.bf16.mxu1 %v2965_v31  ;;  %v3015_v31 = vld [vmem:[#allocation4 + $0x88] sm:$0xff]  }
  0xaf   :  { %1420 = vmatpush2.bf16.msra.mxu0 %v2938_v32  ;;  %v3016_v32 = vld [vmem:[#allocation4 + $0xc0] sm:$0xff]  }
  0xb0   :  { %2604 = vmatpush3.bf16.msra.mxu1 %v2966_v34  ;;  %1421 = vmatprep.subr.bf16.mxu0 %v2946_v33  ;;  %v3017_v33 = vld [vmem:[#allocation4 + $0x80] sm:$0xff]   ;;  %v263_v34 = vlaneseq }
  0xb1   :  { %2605 = vmatprep.subr.bf16.mxu1 %v2968_v35 }
  0xb2   :  { %v3205_v35 = vshrl.u32 %v263_v34, 7 }
  0xb3   :  { %1422 = vmatpush2.bf16.msra.mxu0 %v2944_v36 }
  0xb4   :  { %2606 = vmatpush3.bf16.msra.mxu1 %v2969_v37  ;;  %1423 = vmatprep.subr.bf16.mxu0 %v2952_v42  ;;  %v265_v36 = vsub.s32 0, %v3205_v35  ;;  %v269_v37 = vsub.s32 1, %v3205_v35  ;;  %v3212_v42 = vld [vmem:[%s3292_s2] sm:$0x7f] }
  0xb5   :  { %2607 = vmatprep.subr.bf16.mxu1 %v2971_v38 }
  0xb7   :  { %1424 = vmatpush2.bf16.msra.mxu0 %v2950_v39  ;;  %v266_v39 = vrot.slane %v3212_v42, %v265_v36 }
  0xb8   :  { %2608 = vmatpush3.bf16.msra.mxu1 %v2972_v41  ;;  %1425 = vmatprep.subr.bf16.mxu0 %v2957_v40  ;;  %v270_v40 = vrot.slane %v3212_v42, %v269_v37 }
  0xb9   :  { %2609 = vmatprep.subr.bf16.mxu1 %v2974_v43 }
  0xbb   :  { %1426 = vmatpush2.bf16.msra.mxu0 %v2955_v51 }
  0xbc   :  { %2610 = vmatpush3.bf16.msra.mxu1 %v2975_v44  ;;  %1427 = vmatprep.subr.bf16.mxu0 %v2962_v45 }
  0xbd   :  { %2611 = vmatprep.subr.bf16.mxu1 %v2977_v46  ;;  %v3219_v46 = vld [vmem:[%s3293_s3] sm:$0x7f] }
  0xbf   :  { %1428 = vmatpush2.bf16.msra.mxu0 %v2960_v47 }
  0xc0   :  { %2612 = vmatpush3.bf16.msra.mxu1 %v2978_v48  ;;  %1524 = vmatprep.subr.bf16.mxu0 %v3095_v54 }
  0xc1   :  { %2613 = vmatprep.subr.bf16.mxu1 %v2980_v49 }
  0xc2   :  { %1430 = vmatmul.mubr.bf16.vlgmr.msra.gmra.mxu0 %v3179_v7 }
  0xc3   :  { %1525 = vmatpush1.bf16.msra.mxu0 %v2967_v50  ;;  %2537 = vmatprep.mubr.msk.bf16.mxu0 %vm1199_vm0, %v3043_v58 }
  0xc4   :  { %2614 = vmatpush3.bf16.msra.mxu1 %v2981_v52  ;;  %1526 = vmatprep.subr.bf16.mxu0 %v3095_v54  ;;  %v1588_v52 = vrot.slane %v3219_v46, %v269_v37 }
  0xc5   :  { %2621 = vmatprep.subr.bf16.mxu1 %v2986_v53 }
  0xc7   :  { %1516 = vmatmul.mubr.bf16.vlgmr.msra.gmra.mxu1 %v3179_v7  ;;  %1527 = vmatpush1.bf16.msra.mxu0 %v2970_v55  ;;  %v2994_v7 = vld [vmem:[#allocation4 + $0x58] sm:$0xff]   ;;  %v1584_v55 = vrot.slane %v3219_v46, %v265_v36 }
  0xc8   :  { %2622 = vmatpush3.bf16.msra.mxu1 %v2987_v56  ;;  %1528 = vmatprep.subr.bf16.mxu0 %v3095_v54 }
  0xc9   :  { %2623 = vmatprep.subr.bf16.mxu1 %v2988_v57 }
  0xcb   :  { %1529 = vmatpush1.bf16.msra.mxu0 %v2973_v59 }
  0xcc   :  { %2624 = vmatpush3.bf16.msra.mxu1 %v2989_v60  ;;  %1530 = vmatprep.subr.bf16.mxu0 %v3095_v54 }
  0xcd   :  { %2625 = vmatprep.subr.bf16.mxu1 %v2990_v61 }
  0xcf   :  { %1531 = vmatpush1.bf16.msra.mxu0 %v2976_v62 }
  0xd0   :  { %2626 = vmatpush3.bf16.msra.mxu1 %v2991_v63  ;;  %1532 = vmatprep.subr.bf16.mxu0 %v3095_v54 }
  0xd1   :  { %2627 = vmatprep.subr.bf16.mxu1 %v2992_v0 }
  0xd3   :  { %1533 = vmatpush1.bf16.msra.mxu0 %v2979_v1 }
  0xd4   :  { %2628 = vmatpush3.bf16.msra.mxu1 %v2993_v2  ;;  %1534 = vmatprep.subr.bf16.mxu0 %v3095_v54 }
  0xd5   :  { %2629 = vmatprep.subr.bf16.mxu1 %v2994_v7  ;;  %v3096_v7 = vmov 0.0  }
  0xd7   :  { %1535 = vmatpush1.bf16.msra.mxu0 %v2982_v29 }
  0xd8   :  { %2630 = vmatpush3.bf16.msra.mxu1 %v2995_v3  ;;  %1536 = vmatprep.subr.bf16.mxu0 %v3095_v54 }
  0xd9   :  { %2631 = vmatprep.subr.bf16.mxu1 %v2996_v4  ;;  %v3019_v4 = vld [vmem:[#allocation4 + $0x138] sm:$0xff]  }
  0xdb   :  { %1537 = vmatpush1.bf16.msra.mxu0 %v2983_v5 }
  0xdc   :  { %2632 = vmatpush3.bf16.msra.mxu1 %v2997_v6  ;;  %1538 = vmatprep.subr.bf16.mxu0 %v3095_v54  ;;  %v3020_v6 = vld [vmem:[#allocation4 + $0x170] sm:$0xff]  }
  0xdd   :  { %2633 = vmatprep.subr.bf16.mxu1 %v2998_v8  ;;  %v3021_v8 = vld [vmem:[#allocation4 + $0x130] sm:$0xff]  }
  0xdf   :  { %1539 = vmatpush1.bf16.msra.mxu0 %v2984_v9  ;;  %v3022_v9 = vld [vmem:[#allocation4 + $0x168] sm:$0xff]  }
  0xe0   :  { %2634 = vmatpush3.bf16.msra.mxu1 %v2999_v10  ;;  %1554 = vmatprep.subr.bf16.mxu0 %v3095_v54  ;;  %v3023_v10 = vld [vmem:[#allocation4 + $0x128] sm:$0xff]  }
  0xe1   :  { %2635 = vmatprep.subr.bf16.mxu1 %v3000_v12  ;;  %v3025_v12 = vld [vmem:[#allocation4 + $0x120] sm:$0xff]  }
  0xe3   :  { %1555 = vmatpush2.bf16.msra.mxu0 %v1223_v14  ;;  %v273_v14 = vsub.s32 2, %v3205_v35 }
  0xe4   :  { %2636 = vmatpush3.bf16.msra.mxu1 %v3001_v13  ;;  %2643 = vmatprep.subr.bf16.mxu0 %v3002_v15  ;;  %v3026_v13 = vld [vmem:[#allocation4 + $0x158] sm:$0xff]   ;;  %v277_v15 = vsub.s32 3, %v3205_v35 }
  0xe5   :  { %2665 = vmatprep.subr.bf16.mxu1 %v3018_v16  ;;  %v3027_v16 = vld [vmem:[#allocation4 + $0x118] sm:$0xff]  }
  0xe6   :  { %1557 = vmatmul.mubr.bf16.vlgmr.msra.gmra.mxu0 %v3044_v19  ;;  %v278_v19 = vrot.slane %v3212_v42, %v277_v15  ;;  %v1596_v34 = vrot.slane %v3219_v46, %v277_v15 }
  0xe7   :  { %2644 = vmatpush3.bf16.msra.mxu0 %v3003_v17  ;;  %v3028_v17 = vld [vmem:[#allocation4 + $0x150] sm:$0xff]  }
  0xe8   :  { %2645 = vmatprep.subr.bf16.mxu0 %v3004_v18  ;;  %v274_v18 = vrot.slane %v3212_v42, %v273_v14 }
  0xeb   :  { %2646 = vmatpush3.bf16.msra.mxu0 %v3005_v20  ;;  %v3029_v20 = vld [vmem:[#allocation4 + $0x110] sm:$0xff]  }
  0xec   :  { %2647 = vmatprep.subr.bf16.mxu0 %v3006_v21 }
  0xef   :  { %2648 = vmatpush3.bf16.msra.mxu0 %v3007_v22 }
  0xf0   :  { %2649 = vmatprep.subr.bf16.mxu0 %v3008_v23  ;;  %v3030_v23 = vld [vmem:[#allocation4 + $0x148] sm:$0xff]  }
  0xf3   :  { %2650 = vmatpush3.bf16.msra.mxu0 %v3009_v24 }
  0xf4   :  { %2651 = vmatprep.subr.bf16.mxu0 %v3010_v25 }
  0xf7   :  { %2652 = vmatpush3.bf16.msra.mxu0 %v3011_v26 }
  0xf8   :  { %2653 = vmatprep.subr.bf16.mxu0 %v3012_v27 }
  0xfb   :  { %2654 = vmatpush3.bf16.msra.mxu0 %v3013_v28  ;;  %v3031_v28 = vld [vmem:[#allocation4 + $0x108] sm:$0xff]  }
  0xfc   :  { %2655 = vmatprep.subr.bf16.mxu0 %v3014_v30 }
  0xff   :  { %2656 = vmatpush3.bf16.msra.mxu0 %v3015_v31  ;;  %v3032_v31 = vld [vmem:[#allocation4 + $0x140] sm:$0xff]  }
 0x100   :  { %2657 = vmatprep.subr.bf16.mxu0 %v3016_v32 }
 0x103   :  { %2658 = vmatpush3.bf16.msra.mxu0 %v3017_v33  ;;  %v1302_v38 = vpop.f32.mrf.mxu1 }
 0x104   :  { %2698 = vmatprep.subr.bf16.mxu0 %v3096_v7 }
 0x105   :  { %v1304_v43 = vpop.f32.mrf.mxu1 }
 0x107   :  { %v1306_v48 = vpop.f32.mrf.mxu1 }
 0x109   :  { %v1308_v58 = vpop.f32.mrf.mxu1 }
 0x11e   :  { %v1259_v41 = vpop.f32.mrf.mxu0 }
 0x11f   :  { %v1260_v44 = vadd.f32 %v1259_v41, %v266_v39  ;;  %v3033_v41 = vld [vmem:[#allocation4 + $0x100] sm:$0xff]  }
 0x120   :  { %v1261_v51 = vpop.f32.mrf.mxu0 }
 0x121   :  { %v1262_v45 = vadd.f32 %v1261_v51, %v270_v40  ;;  %v1303_v54 = vadd.f32 %v1302_v38, %v1260_v44  ;;  %v1592_v38 = vrot.slane %v3219_v46, %v273_v14 }
 0x122   :  { %v1263_v47 = vpop.f32.mrf.mxu0 }
 0x123   :  { %v1264_v49 = vadd.f32 %v1263_v47, %v266_v39  ;;  %v1305_v50 = vadd.f32 %v1304_v43, %v1262_v45  ;;  %v1616_v62 = vmul.f32 %v1584_v55, %v1303_v54  ;;  %vm1565_vm4 = vcmp.ge.f32.partialorder %v1303_v54, 0.0 }
 0x124   :  { %v1265_v53 = vpop.f32.mrf.mxu0 }
 0x125   :  { %v1307_v56 = vadd.f32 %v1306_v48, %v1264_v49  ;;  %v1266_v57 = vadd.f32 %v1265_v53, %v270_v40  ;;  %v1617_v60 = vmul.f32 %v1588_v52, %v1305_v50  ;;  %vm1566_vm3 = vcmp.ge.f32.partialorder %v1305_v50, 0.0 }
 0x126   :  { %v1630_v29 = vsel %vm1565_vm4, %v1303_v54, %v1616_v62 }
 0x127   :  { %v1623_v59 = vmul.f32 %v1584_v55, %v1307_v56  ;;  %vm1572_vm2 = vcmp.ge.f32.partialorder %v1307_v56, 0.0  ;;  %v1309_v61 = vadd.f32 %v1308_v58, %v1266_v57  ;;  %v1631_v1 = vsel %vm1566_vm3, %v1305_v50, %v1617_v60 }
 0x128   :  { %v281_v58 = vsub.s32 4, %v3205_v35 }
 0x129   :  { %vm1573_vm5 = vcmp.ge.f32.partialorder %v1309_v61, 0.0  ;;  %v1624_v63 = vmul.f32 %v1588_v52, %v1309_v61  ;;  %v1637_v0 = vsel %vm1572_vm2, %v1307_v56, %v1623_v59  ;;  %v3034_v56 = vld [vmem:[#allocation4 + $0x180] sm:$0xff]   ;;  %v285_v59 = vsub.s32 5, %v3205_v35 }
 0x12a   :  { %v1644_v5 = vpack.c.bf16 %v1637_v0, %v1630_v29 }
 0x12b   :  { %v1638_v2 = vsel %vm1573_vm5, %v1309_v61, %v1624_v63  ;;  %v282_v61 = vrot.slane %v3212_v42, %v281_v58  ;;  %v286_v62 = vrot.slane %v3212_v42, %v285_v59 }
 0x12c   :  { %v1645_v3 = vpack.c.bf16 %v1638_v2, %v1631_v1 }
 0x12e   :  { %2086 = vmatprep.mubr.bf16.mxu1 %v1645_v3 }
 0x12f   :  { %2087 = vmatmul.mubr.bf16.vlgmr.msra.gmra.mxu1 %v1644_v5 }
 0x130   :  { %2666 = vmatpush3.bf16.msra.mxu1 %v3019_v4 }
 0x131   :  { %2667 = vmatprep.subr.bf16.mxu1 %v3020_v6 }
 0x134   :  { %2668 = vmatpush3.bf16.msra.mxu1 %v3021_v8  ;;  %v1604_v8 = vrot.slane %v3219_v46, %v285_v59 }
 0x135   :  { %2669 = vmatprep.subr.bf16.mxu1 %v3022_v9 }
 0x138   :  { %2670 = vmatpush3.bf16.msra.mxu1 %v3023_v10 }
 0x139   :  { %2671 = vmatprep.subr.bf16.mxu1 %v3024_v11  ;;  %v1600_v11 = vrot.slane %v3219_v46, %v281_v58 }
 0x13c   :  { %2672 = vmatpush3.bf16.msra.mxu1 %v3025_v12 }
 0x13d   :  { %2673 = vmatprep.subr.bf16.mxu1 %v3026_v13 }
 0x140   :  { %2674 = vmatpush3.bf16.msra.mxu1 %v3027_v16 }
 0x141   :  { %2675 = vmatprep.subr.bf16.mxu1 %v3028_v17 }
 0x142   :  { %v1388_v22 = vpop.f32.mrf.mxu0 }
 0x143   :  { %v1345_v21 = vpop.f32.mrf.mxu1 }
 0x144   :  { %v1390_v25 = vpop.f32.mrf.mxu0  ;;  %v1346_v26 = vadd.f32 %v1345_v21, %v274_v18  ;;  %2676 = vmatpush3.bf16.msra.mxu1 %v3029_v20 }
 0x145   :  { %v1347_v24 = vpop.f32.mrf.mxu1  ;;  %2677 = vmatprep.subr.bf16.mxu1 %v3030_v23 }
 0x146   :  { %v1348_v27 = vadd.f32 %v1347_v24, %v278_v19  ;;  %v1392_v33 = vpop.f32.mrf.mxu0  ;;  %v1389_v39 = vadd.f32 %v1388_v22, %v1346_v26 }
 0x147   :  { %v1349_v30 = vpop.f32.mrf.mxu1 }
 0x148   :  { %v1350_v32 = vadd.f32 %v1349_v30, %v274_v18  ;;  %v1391_v36 = vadd.f32 %v1390_v25, %v1348_v27  ;;  %2678 = vmatpush3.bf16.msra.mxu1 %v3031_v28  ;;  %v1394_v44 = vpop.f32.mrf.mxu0  ;;  %v1618_v48 = vmul.f32 %v1592_v38, %v1389_v39  ;;  %vm1567_vm8 = vcmp.ge.f32.partialorder %v1389_v39, 0.0 }
 0x149   :  { %v1351_v37 = vpop.f32.mrf.mxu1  ;;  %2679 = vmatprep.subr.bf16.mxu1 %v3032_v31  ;;  %v289_v28 = vsub.s32 6, %v3205_v35 }
 0x14a   :  { %v1393_v40 = vadd.f32 %v1392_v33, %v1350_v32  ;;  %v1352_v43 = vadd.f32 %v1351_v37, %v278_v19  ;;  %v1619_v45 = vmul.f32 %v1596_v34, %v1391_v36  ;;  %vm1568_vm7 = vcmp.ge.f32.partialorder %v1391_v36, 0.0 }
 0x14b   :  { %v1632_v54 = vsel %vm1567_vm8, %v1389_v39, %v1618_v48  ;;  %v290_v32 = vrot.slane %v3212_v42, %v289_v28  ;;  %v1608_v39 = vrot.slane %v3219_v46, %v289_v28  ;;  %v3036_v46 = vld [vmem:[%s3297_s7 + $0x30] sm:$0xff]  }
 0x14c   :  { %v1625_v51 = vmul.f32 %v1592_v38, %v1393_v40  ;;  %vm1574_vm6 = vcmp.ge.f32.partialorder %v1393_v40, 0.0  ;;  %v1395_v47 = vadd.f32 %v1394_v44, %v1352_v43  ;;  %2680 = vmatpush3.bf16.msra.mxu1 %v3033_v41  ;;  %v1633_v52 = vsel %vm1568_vm7, %v1391_v36, %v1619_v45 }
 0x14d   :  { %2704 = vmatprep.subr.bf16.mxu1 %v3096_v7 }
 0x14e   :  { %vm1575_vm9 = vcmp.ge.f32.partialorder %v1395_v47, 0.0  ;;  %v1626_v49 = vmul.f32 %v1596_v34, %v1395_v47  ;;  %v1639_v50 = vsel %vm1574_vm6, %v1393_v40, %v1625_v51 }
 0x14f   :  { %v1646_v57 = vpack.c.bf16 %v1639_v50, %v1632_v54  ;;  %v3037_v50 = vld [vmem:[%s3297_s7 + $0x28] sm:$0xff]   ;;  %v3040_v54 = vld [vmem:[%s3297_s7 + $0x10] sm:$0xff]  }
 0x150   :  { %v1640_v53 = vsel %vm1575_vm9, %v1395_v47, %v1626_v49  ;;  %v3035_v49 = vld [vmem:[%s3297_s7 + $0x38] sm:$0xff]  }
 0x151   :  { %v1647_v55 = vpack.c.bf16 %v1640_v53, %v1633_v52  ;;  %v3038_v52 = vld [vmem:[%s3297_s7 + $0x20] sm:$0xff]   ;;  %v3039_v53 = vld [vmem:[%s3297_s7 + $0x18] sm:$0xff]  }
 0x153   :  { %2127 = vmatprep.mubr.bf16.mxu0 %v1647_v55  ;;  %v3041_v55 = vld [vmem:[%s3297_s7 + $0x8] sm:$0xff]  }
 0x154   :  { %2128 = vmatmul.mubr.bf16.vlgmr.msra.gmra.mxu0 %v1646_v57 }
 0x155   :  { %2699 = vmatpush3.bf16.msra.mxu0 %v3034_v56  ;;  %2700 = vmatprep.mubr.msk.bf16.mxu0 %vm3097_vm10, %v3096_v7  ;;  %v3042_v56 = vld [vmem:[%s3297_s7] sm:$0xff]  }
 0x167   :  { %v1474_v60 = vpop.f32.mrf.mxu1 }
 0x169   :  { %v1476_v0 = vpop.f32.mrf.mxu1 }
 0x16b   :  { %v1478_v4 = vpop.f32.mrf.mxu1 }
 0x16d   :  { %v1480_v14 = vpop.f32.mrf.mxu1 }
 0x182   :  { %v1431_v63 = vpop.f32.mrf.mxu0 }
 0x183   :  { %v1432_v2 = vadd.f32 %v1431_v63, %v282_v61 }
 0x184   :  { %v1433_v1 = vpop.f32.mrf.mxu0 }
 0x185   :  { %v1434_v29 = vadd.f32 %v1433_v1, %v286_v62  ;;  %v1475_v10 = vadd.f32 %v1474_v60, %v1432_v2 }
 0x186   :  { %v1435_v3 = vpop.f32.mrf.mxu0 }
 0x187   :  { %v1436_v5 = vadd.f32 %v1435_v3, %v282_v61  ;;  %v1477_v6 = vadd.f32 %v1476_v0, %v1434_v29  ;;  %v1620_v18 = vmul.f32 %v1600_v11, %v1475_v10  ;;  %vm1569_vm13 = vcmp.ge.f32.partialorder %v1475_v10, 0.0  ;;  %v2615_v26 = vpop.f32.mrf.mxu1  ;;  %v2538_v29 = vld [vmem:[%s3295_s5] ss:$0 sm:$0xff] }
 0x188   :  { %v1437_v9 = vpop.f32.mrf.mxu0 }
 0x189   :  { %v1479_v12 = vadd.f32 %v1478_v4, %v1436_v5  ;;  %v1438_v13 = vadd.f32 %v1437_v9, %v286_v62  ;;  %v1621_v16 = vmul.f32 %v1604_v8, %v1477_v6  ;;  %vm1570_vm12 = vcmp.ge.f32.partialorder %v1477_v6, 0.0  ;;  %v2616_v27 = vpop.f32.mrf.mxu1 }
 0x18a   :  { %v1634_v23 = vsel %vm1569_vm13, %v1475_v10, %v1620_v18  ;;  %v2617_v31 = vadd.f32 %v2616_v27, %v2615_v26  ;;  %v2589_v18 = vld [vmem:[%s3296_s6] ss:$0 sm:$0xff] }
 0x18b   :  { %v1627_v15 = vmul.f32 %v1600_v11, %v1479_v12  ;;  %vm1576_vm11 = vcmp.ge.f32.partialorder %v1479_v12, 0.0  ;;  %v1481_v17 = vadd.f32 %v1480_v14, %v1438_v13  ;;  %v1635_v21 = vsel %vm1570_vm12, %v1477_v6, %v1621_v16  ;;  %v2618_v30 = vpop.f32.mrf.mxu1 }
 0x18c   :  { %v1518_v36 = vadd.f32 %v2617_v31, %v290_v32 }
 0x18d   :  { %vm1577_vm14 = vcmp.ge.f32.partialorder %v1481_v17, 0.0  ;;  %v1628_v19 = vmul.f32 %v1604_v8, %v1481_v17  ;;  %v1641_v20 = vsel %vm1576_vm11, %v1479_v12, %v1627_v15  ;;  %v2619_v33 = vpop.f32.mrf.mxu1 }
 0x18e   :  { %v1648_v25 = vpack.c.bf16 %v1641_v20, %v1634_v23  ;;  %v2620_v34 = vadd.f32 %v2619_v33, %v2618_v30  ;;  %v2590_v30 = vld [vmem:[%s3298_s8] ss:$0 sm:$0xff] }
 0x18f   :  { %v1642_v22 = vsel %vm1577_vm14, %v1481_v17, %v1628_v19 }
 0x190   :  { %v1649_v24 = vpack.c.bf16 %v1642_v22, %v1635_v21  ;;  %v1521_v41 = vadd.f32 %v2620_v34, %v290_v32 }
 0x192   :  { %2168 = vmatprep.mubr.bf16.mxu1 %v1649_v24 }
 0x193   :  { %2169 = vmatmul.mubr.bf16.vlgmr.msra.gmra.mxu1 %v1648_v25 }
 0x194   :  { %2720 = vmatprep.mubr.msk.bf16.mxu1 %vm3097_vm10, %v3096_v7  ;;  %2705 = vmatpush3.bf16.msra.mxu1 %v3035_v49 }
 0x195   :  { %2706 = vmatprep.subr.bf16.mxu1 %v3096_v7 }
 0x198   :  { %2707 = vmatpush3.bf16.msra.mxu1 %v3036_v46 }
 0x199   :  { %2708 = vmatprep.subr.bf16.mxu1 %v3096_v7 }
 0x19c   :  { %2709 = vmatpush3.bf16.msra.mxu1 %v3037_v50 }
 0x19d   :  { %2710 = vmatprep.subr.bf16.mxu1 %v3096_v7 }
 0x1a0   :  { %2711 = vmatpush3.bf16.msra.mxu1 %v3038_v52 }
 0x1a1   :  { %2712 = vmatprep.subr.bf16.mxu1 %v3096_v7 }
 0x1a4   :  { %2713 = vmatpush3.bf16.msra.mxu1 %v3039_v53 }
 0x1a5   :  { %2714 = vmatprep.subr.bf16.mxu1 %v3096_v7 }
 0x1a6   :  { %v1558_v37 = vpop.f32.mrf.mxu0 }
 0x1a7   :  { %v1559_v38 = vadd.f32 %v1558_v37, %v1518_v36 }
 0x1a8   :  { %v1560_v40 = vpop.f32.mrf.mxu0  ;;  %2715 = vmatpush3.bf16.msra.mxu1 %v3040_v54 }
 0x1a9   :  { %v1622_v51 = vmul.f32 %v1608_v39, %v1559_v38  ;;  %vm1571_vm15 = vcmp.ge.f32.partialorder %v1559_v38, 0.0  ;;  %2716 = vmatprep.subr.bf16.mxu1 %v3096_v7 }
 0x1aa   :  { %v1561_v43 = vpop.f32.mrf.mxu0 }
 0x1ab   :  { %v1562_v44 = vadd.f32 %v1561_v43, %v1521_v41  ;;  %v1636_v47 = vsel %vm1571_vm15, %v1559_v38, %v1622_v51 }
 0x1ac   :  { %v1563_v45 = vpop.f32.mrf.mxu0  ;;  %2717 = vmatpush3.bf16.msra.mxu1 %v3041_v55 }
 0x1ad   :  { %vm1578_vm0 = vcmp.ge.f32.partialorder %v1562_v44, 0.0  ;;  %v1629_v35 = vmul.f32 %v1608_v39, %v1562_v44  ;;  %2718 = vmatprep.subr.bf16.mxu1 %v3096_v7 }
 0x1af   :  { %v1643_v48 = vsel %vm1578_vm0, %v1562_v44, %v1629_v35 }
 0x1b0   :  { %v1650_v42 = vpack.c.bf16 %v1643_v48, %v1636_v47  ;;  %2719 = vmatpush3.bf16.msra.mxu1 %v3042_v56 }
 0x1b2   :  { %2701 = vmatmul.mubr.msk.bf16.vlgmr.msra.gmra.mxu0 %vm2050_vm1, %v1650_v42 }
 0x1ef   :  { %v2637_v57 = vpop.f32.mrf.mxu1 }
 0x1f1   :  { %v2638_v58 = vpop.f32.mrf.mxu1 }
 0x1f2   :  { %v2639_v2 = vadd.f32 %v2638_v58, %v2637_v57 }
 0x1f3   :  { %v2640_v59 = vpop.f32.mrf.mxu1 }
 0x1f4   :  { %v2089_v5 = vadd.f32 %v2639_v2, %v2538_v29 }
 0x1f5   :  { %v2641_v60 = vpop.f32.mrf.mxu1 }
 0x1f6   :  { %v2642_v6 = vadd.f32 %v2641_v60, %v2640_v59 }
 0x1f8   :  { %v2092_v12 = vadd.f32 %v2642_v6, %v2538_v29 }
 0x214   :  { %v2659_v61 = vpop.f32.mrf.mxu0 }
 0x216   :  { %v2660_v63 = vpop.f32.mrf.mxu0 }
 0x217   :  { %v2661_v3 = vadd.f32 %v2660_v63, %v2659_v61 }
 0x218   :  { %v2662_v1 = vpop.f32.mrf.mxu0 }
 0x219   :  { %v2130_v10 = vadd.f32 %v2661_v3, %v2089_v5 }
 0x21a   :  { %v2663_v4 = vpop.f32.mrf.mxu0 }
 0x21b   :  { %v2664_v11 = vadd.f32 %v2663_v4, %v2662_v1 }
 0x21d   :  { %v2133_v16 = vadd.f32 %v2664_v11, %v2092_v12 }
 0x253   :  { %v2681_v62 = vpop.f32.mrf.mxu1 }
 0x255   :  { %v2682_v0 = vpop.f32.mrf.mxu1 }
 0x256   :  { %v2683_v8 = vadd.f32 %v2682_v0, %v2681_v62 }
 0x257   :  { %v2684_v7 = vpop.f32.mrf.mxu1 }
 0x258   :  { %v2171_v14 = vadd.f32 %v2683_v8, %v2130_v10 }
 0x259   :  { %v2685_v9 = vpop.f32.mrf.mxu1 }
 0x25a   :  { %v2686_v13 = vadd.f32 %v2685_v9, %v2684_v7 }
 0x25c   :  { %v2174_v20 = vadd.f32 %v2686_v13, %v2133_v16 }
 0x272   :  { %v2211_v15 = vpop.f32.mrf.mxu0 }
 0x273   :  { %v2212_v17 = vadd.f32 %v2211_v15, %v2171_v14 }
 0x274   :  { %v2702_v19 = vpop.f32.mrf.mxu0 }
 0x275   :  { %v2227_v22 = vmul.f32 %v2589_v18, %v2212_v17  ;;  %vm2218_vm2 = vcmp.ge.f32.partialorder %v2212_v17, 0.0 }
 0x276   :  { %v2214_v21 = vpop.f32.mrf.mxu0 }
 0x277   :  { %v2215_v23 = vadd.f32 %v2214_v21, %v2174_v20  ;;  %v2229_v26 = vsel %vm2218_vm2, %v2212_v17, %v2227_v22 }
 0x278   :  { %v2703_v24 = vpop.f32.mrf.mxu0 }
 0x279   :  { %vm2219_vm3 = vcmp.ge.f32.partialorder %v2215_v23, 0.0  ;;  %v2228_v25 = vmul.f32 %v2589_v18, %v2215_v23 }
 0x27b   :  { %v2230_v27 = vsel %vm2219_vm3, %v2215_v23, %v2228_v25 }
 0x27c   :  { %v2231_v28 = vpack.c.bf16 %v2230_v27, %v2229_v26 }
 0x27e   :  { %2721 = vmatmul.mubr.bf16.vlgmr.msra.gmra.mxu1 %v2231_v28 }
 0x33e   :  { %v2337_v31 = vpop.f32.mrf.mxu1 }
 0x33f   :  { %v2338_v32 = vadd.f32 %v2590_v30, %v2337_v31 }
 0x340   :  { %v2722_v33 = vpop.f32.mrf.mxu1 }
 0x341   :  { %2344 = vst [vmem:[%s3299_s9] sm:$0xff] %v2338_v32 }
 0x342   :  { %v2340_v34 = vpop.f32.mrf.mxu1 }
 0x343   :  { %v2341_v36 = vadd.f32 %v2590_v30, %v2340_v34 }
 0x344   :  { %v2723_v37 = vpop.f32.mrf.mxu1 }
 0x345   :  { %2345 = vst [vmem:[%s3299_s9 + $0x8] sm:$0xff] %v2341_v36 }
 0x346   :  { %2350 = vsyncpa [#allocation3], 1 }
 0x347   :  { %2351 = vsyncpa [#allocation5], 1 }

</bundles_post_ra>
